<compile_context>
chip_gen: v6e
topology: v6e:2x2x1
jax: 0.10.0
libtpu: 0.0.40
codegen_flags: <defaults>
</compile_context>

<pallas_src>
import functools

import jax
import jax.numpy as jnp
from jax import lax
from jax.experimental import pallas as pl
from jax.experimental.pallas import tpu as pltpu

BN_EPS = 1e-5
LEAKY_SLOPE = 0.01  # F.leaky_relu default


# ------------------------------ Pallas kernels ------------------------------

def _conv_bn_lrelu_kernel(p_ref, w_ref, gamma_ref, beta_ref, o_ref):
    """Conv-as-GEMM (lane-dense output) + BatchNorm(batch stats) + LeakyReLU.

    p_ref:     (Cin*k*k, M) bf16 patches, M = N*Ho*Wo  (lane axis)
    w_ref:     (Cout, Cin*k*k) bf16
    gamma/beta:(Cout, 1) f32
    o_ref:     (Cout, M) bf16  -- lane-dense stores; BN stats over (N,H,W) ==
               the lane axis.  All BN math in f32.
    """
    y = jnp.dot(w_ref[...], p_ref[...], preferred_element_type=jnp.float32)
    # Single un-tiled M block => these are the exact global batch statistics.
    mean = jnp.mean(y, axis=1, keepdims=True)
    var = jnp.mean(jnp.square(y - mean), axis=1, keepdims=True)
    y = (y - mean) * lax.rsqrt(var + BN_EPS)
    y = y * gamma_ref[...] + beta_ref[...]
    o_ref[...] = jnp.where(y > 0, y, LEAKY_SLOPE * y).astype(o_ref.dtype)


def _tail_kernel(xf_ref, wg_ref, bg_ref, wfx_ref, wfg_ref, genre_ref,
                 bfc_ref, wh_ref, bh_ref, eps_ref,
                 zm_ref, zv_ref, z_ref, acc_ref, *, latent_dim):
    """Fused post-conv tail, K-tiled over flat_dim.

    Per grid step k (a chunk of flat_dim features):
      g_k   = relu(genre @ Wgenre[:, k] + bgenre[k])        (never hits HBM)
      acc  += xf[:, k] @ Wfc_x[k] + g_k @ Wfc_g[k]           (virtual concat)
    Last step:
      h = relu(acc + bfc); heads = h @ [Wzm | Wzv] + [bzm | bzv]
      z_mean, z_log_var = split(heads); clamp; z = zm + exp(0.5*zlv)*eps
    """
    k = pl.program_id(0)

    @pl.when(k == 0)
    def _():
        acc_ref[...] = jnp.zeros_like(acc_ref)

    g = jnp.dot(genre_ref[...].astype(jnp.bfloat16), wg_ref[...],
                preferred_element_type=jnp.float32) + bg_ref[...]
    g = jnp.maximum(g, 0.0)

    acc_ref[...] += (
        jnp.dot(xf_ref[...], wfx_ref[...], preferred_element_type=jnp.float32)
        + jnp.dot(g.astype(jnp.bfloat16), wfg_ref[...],
                  preferred_element_type=jnp.float32))

    @pl.when(k == pl.num_programs(0) - 1)
    def _():
        h = jnp.maximum(acc_ref[...] + bfc_ref[...], 0.0)
        heads = jnp.dot(h.astype(jnp.bfloat16), wh_ref[...],
                        preferred_element_type=jnp.float32) + bh_ref[...]
        zm = heads[:, :latent_dim]
        zlv = jnp.clip(heads[:, latent_dim:], -10.0, 10.0)   # torch.clamp(-10, 10)
        zm_ref[...] = zm
        zv_ref[...] = zlv
        z_ref[...] = zm + jnp.exp(0.5 * zlv) * eps_ref[...]  # reparameterization


# ----------------------------- kernel wrappers -------------------------------

def _vmem_spec():
    return pl.BlockSpec(memory_space=pltpu.MemorySpace.VMEM)


def conv_bn_lrelu(patches_t, w, gamma, beta):
    cout = w.shape[0]
    m = patches_t.shape[1]
    return pl.pallas_call(
        _conv_bn_lrelu_kernel,
        out_shape=jax.ShapeDtypeStruct((cout, m), jnp.bfloat16),
        in_specs=[_vmem_spec() for _ in range(4)],
        out_specs=_vmem_spec(),
    )(patches_t, w, gamma, beta)


def fused_tail(xf, genre, eps, p, tk=512):
    n, flat = xf.shape
    gd = genre.shape[1]
    hidden = p["fc_b"].shape[1]
    latent = eps.shape[1]
    tk = min(tk, flat)
    assert flat % tk == 0, "flat_dim must be divisible by the K tile"
    nk = flat // tk
    out_sds = jax.ShapeDtypeStruct((n, latent), jnp.float32)

    grid_spec = pltpu.PrefetchScalarGridSpec(
        num_scalar_prefetch=0,
        grid=(nk,),
        in_specs=[
            pl.BlockSpec((n, tk), lambda k: (0, k)),              # xf chunk
            pl.BlockSpec((gd, tk), lambda k: (0, k)),             # fc_genre W chunk
            pl.BlockSpec((1, tk), lambda k: (0, k)),              # fc_genre b chunk
            pl.BlockSpec((tk, hidden), lambda k: (k, 0)),         # fc W (xf rows)
            pl.BlockSpec((tk, hidden), lambda k: (k, 0)),         # fc W (g rows)
            pl.BlockSpec((n, gd), lambda k: (0, 0)),              # genre (resident)
            pl.BlockSpec((1, hidden), lambda k: (0, 0)),          # fc bias
            pl.BlockSpec((hidden, 2 * latent), lambda k: (0, 0)),  # fused heads W
            pl.BlockSpec((1, 2 * latent), lambda k: (0, 0)),      # fused heads b
            pl.BlockSpec((n, latent), lambda k: (0, 0)),          # eps
        ],
        out_specs=(
            pl.BlockSpec((n, latent), lambda k: (0, 0)),
            pl.BlockSpec((n, latent), lambda k: (0, 0)),
            pl.BlockSpec((n, latent), lambda k: (0, 0)),
        ),
        scratch_shapes=[pltpu.VMEM((n, hidden), jnp.float32)],
    )
    return pl.pallas_call(
        functools.partial(_tail_kernel, latent_dim=latent),
        out_shape=(out_sds, out_sds, out_sds),
        grid_spec=grid_spec,
        compiler_params=pltpu.CompilerParams(
            dimension_semantics=("arbitrary",)),   # K is a reduction axis
    )(xf, p["wg"], p["bg"], p["wfx"], p["wfg"], genre,
      p["fc_b"], p["wh"], p["bh"], eps)


# -------------------------------- glue (JAX) ---------------------------------

def im2col_cmajor(xc, k=3, stride=2, pad=1):
    """xc: (C, N, H, W) -> patches (C*k*k, N*Ho*Wo). No transposes: the stack
    order matches PyTorch's (Cout, Cin, kh, kw) weight flatten directly."""
    c, n, h, w = xc.shape
    xp = jnp.pad(xc, ((0, 0), (0, 0), (pad, pad), (pad, pad)))
    ho = (h + 2 * pad - k) // stride + 1
    wo = (w + 2 * pad - k) // stride + 1
    cols = [xp[:, :, i:i + stride * ho:stride, j:j + stride * wo:stride]
            for i in range(k) for j in range(k)]
    patches = jnp.stack(cols, axis=1)                  # (C, k*k, N, Ho, Wo)
    return patches.reshape(c * k * k, n * ho * wo), ho, wo
    # TODO(synk): at the real 128x432 size, fold im2col + both convs into one
    # pallas_call (manual strided VMEM reads) and tile M / global-BN the stats.


def conv_layer(xc, w_ck, gamma, beta, k=3, stride=2, pad=1):
    """Conv2d(3x3) + BatchNorm2d(batch stats) + LeakyReLU; C-major in/out."""
    _, n, _, _ = xc.shape
    patches, ho, wo = im2col_cmajor(xc, k=k, stride=stride, pad=pad)
    y = conv_bn_lrelu(patches, w_ck, gamma, beta)      # (Cout, N*Ho*Wo) bf16
    return y.reshape(w_ck.shape[0], n, ho, wo)         # free reshape, stays C-major


def encoder_forward(p, x, genre, eps):
    n, _, h, w = x.shape
    # NCHW (N,1,H,W) -> C-major (1,N,H,W): pure reshape (C == 1), no copy.
    xc = x.astype(jnp.bfloat16).reshape(1, n, h, w)
    h1 = conv_layer(xc, p["w1"], p["bn1_g"], p["bn1_b"])   # (32, N, H/2, W/2)
    h2 = conv_layer(h1, p["w2"], p["bn2_g"], p["bn2_b"])   # (64, N, H/4, W/4)
    c2, _, ho, wo = h2.shape
    # Single small C<->N swap so flatten == torch.flatten on NCHW.
    xf = h2.reshape(c2, n, ho * wo).transpose(1, 0, 2).reshape(n, c2 * ho * wo)
    # Fused: fc_genre + relu, virtual concat, fc + relu, heads, clamp, sample.
    return fused_tail(xf, genre, eps, p)


# ---------------------------------- params -----------------------------------

def init_params(key, genre_dim, latent_dim, flat_dim, hidden):
    """Parameters are created directly in the kernel-friendly layout (the
    one-time reshape/transpose/cast of the PyTorch weights is hoisted here)."""
    ks = jax.random.split(key, 10)
    bf = jnp.bfloat16

    def dense(k, shape, fan_in, dtype=jnp.float32):
        return (jax.random.normal(k, shape, jnp.float32) /
                jnp.sqrt(fan_in)).astype(dtype)

    return {
        # conv weights: PyTorch (Cout, Cin, 3, 3) reshaped to (Cout, Cin*9), bf16
        "w1": dense(ks[0], (32, 1 * 3 * 3), 9.0, bf),
        "bn1_g": jnp.ones((32, 1), jnp.float32),
        "bn1_b": jnp.zeros((32, 1), jnp.float32),
        "w2": dense(ks[1], (64, 32 * 3 * 3), 32.0 * 9.0, bf),
        "bn2_g": jnp.ones((64, 1), jnp.float32),
        "bn2_b": jnp.zeros((64, 1), jnp.float32),
        # fc_genre.weight.T : (genre_dim, flat)
        "wg": dense(ks[2], (genre_dim, flat_dim), float(genre_dim), bf),
        "bg": dense(ks[3], (1, flat_dim), float(genre_dim)),
        # fc.weight.T split into xf rows and g rows (virtual concat)
        "wfx": dense(ks[4], (flat_dim, hidden), float(2 * flat_dim), bf),
        "wfg": dense(ks[5], (flat_dim, hidden), float(2 * flat_dim), bf),
        "fc_b": dense(ks[6], (1, hidden), float(2 * flat_dim)),
        # z_mean / z_log_var heads fused column-wise: (hidden, 2*latent)
        "wh": dense(ks[7], (hidden, 2 * latent_dim), float(hidden), bf),
        "bh": dense(ks[8], (1, 2 * latent_dim), float(hidden)),
    }


# ----------------------------------- main -------------------------------------

if __name__ == "__main__":
    N, H, W = 2, 16, 16
    genre_dim, latent_dim, hidden = 8, 16, 512
    flat_dim = 64 * (H // 4) * (W // 4)   # 1024 here (64*32*108 in the module)

    key = jax.random.PRNGKey(0)
    k_x, k_g, k_eps, k_p = jax.random.split(key, 4)

    x = jax.random.normal(k_x, (N, 1, H, W), jnp.float32)        # NCHW input
    genre = jax.random.normal(k_g, (N, genre_dim), jnp.float32)
    # torch.randn_like(z_mean) -> deterministic JAX normal fed into the kernel
    eps = jax.random.normal(k_eps, (N, latent_dim), jnp.float32)

    params = init_params(k_p, genre_dim, latent_dim, flat_dim, hidden)

    z_mean, z_log_var, z = jax.jit(encoder_forward)(params, x, genre, eps)
    jax.block_until_ready((z_mean, z_log_var, z))

    assert z_mean.shape == (N, latent_dim)
    assert z_log_var.shape == (N, latent_dim)
    assert z.shape == (N, latent_dim)
    assert bool(jnp.all(jnp.isfinite(z)))
    assert bool(jnp.all(z_log_var <= 10.0)) and bool(jnp.all(z_log_var >= -10.0))
    # TODO(synk): BatchNorm running_mean/running_var buffer updates (a training
    # side effect that does not affect this forward's outputs) are not modeled.
    print("KERNEL_OK")
</pallas_src>

<mosaic_0001>
module attributes {stable_mosaic.version = 11 : i64} {
  func.func @_conv_bn_lrelu_kernel(%arg0: memref<9x128xbf16, #tpu.memory_space<vmem>>, %arg1: memref<32x9xbf16, #tpu.memory_space<vmem>>, %arg2: memref<32x1xf32, #tpu.memory_space<vmem>>, %arg3: memref<32x1xf32, #tpu.memory_space<vmem>>, %arg4: memref<32x128xbf16, #tpu.memory_space<vmem>>) attributes {dimension_semantics = [], scalar_prefetch = 0 : i64, scratch_operands = 0 : i64, tpu.core_type = #tpu.core_type<tc>} {
    %c0 = arith.constant 0 : index
    %c0_0 = arith.constant 0 : index
    %0 = vector.load %arg1[%c0, %c0_0] : memref<32x9xbf16, #tpu.memory_space<vmem>>, vector<32x9xbf16>
    %c0_1 = arith.constant 0 : index
    %c0_2 = arith.constant 0 : index
    %1 = vector.load %arg0[%c0_1, %c0_2] : memref<9x128xbf16, #tpu.memory_space<vmem>>, vector<9x128xbf16>
    %cst = arith.constant dense<0.000000e+00> : vector<32x128xf32>
    %2 = tpu.matmul %0, %1, %cst {dimension_numbers = #tpu.dot_dimension_numbers<[1], [0], [0], [1], [0, 0, 1, 1], [], []>} : vector<32x9xbf16>, vector<9x128xbf16>, vector<32x128xf32> -> vector<32x128xf32>
    %cst_3 = arith.constant dense<0.000000e+00> : vector<32xf32>
    %3 = vector.multi_reduction <add>, %2, %cst_3 [1] : vector<32x128xf32> to vector<32xf32>
    %4 = vector.shape_cast %3 : vector<32xf32> to vector<32x1xf32>
    %cst_4 = arith.constant 1.280000e+02 : f32
    %5 = vector.broadcast %cst_4 : f32 to vector<32x1xf32>
    %6 = arith.divf %4, %5 : vector<32x1xf32>
    %7 = vector.broadcast %6 : vector<32x1xf32> to vector<32x128xf32>
    %8 = arith.subf %2, %7 : vector<32x128xf32>
    %9 = arith.mulf %8, %8 : vector<32x128xf32>
    %cst_5 = arith.constant dense<0.000000e+00> : vector<32xf32>
    %10 = vector.multi_reduction <add>, %9, %cst_5 [1] : vector<32x128xf32> to vector<32xf32>
    %11 = vector.shape_cast %10 : vector<32xf32> to vector<32x1xf32>
    %cst_6 = arith.constant 1.280000e+02 : f32
    %12 = vector.broadcast %cst_6 : f32 to vector<32x1xf32>
    %13 = arith.divf %11, %12 : vector<32x1xf32>
    %14 = vector.broadcast %6 : vector<32x1xf32> to vector<32x128xf32>
    %15 = arith.subf %2, %14 : vector<32x128xf32>
    %cst_7 = arith.constant 9.99999974E-6 : f32
    %16 = vector.broadcast %cst_7 : f32 to vector<32x1xf32>
    %17 = arith.addf %13, %16 : vector<32x1xf32>
    %18 = math.rsqrt %17 : vector<32x1xf32>
    %19 = vector.broadcast %18 : vector<32x1xf32> to vector<32x128xf32>
    %20 = arith.mulf %15, %19 : vector<32x128xf32>
    %c0_8 = arith.constant 0 : index
    %c0_9 = arith.constant 0 : index
    %21 = vector.load %arg2[%c0_8, %c0_9] : memref<32x1xf32, #tpu.memory_space<vmem>>, vector<32x1xf32>
    %22 = vector.broadcast %21 : vector<32x1xf32> to vector<32x128xf32>
    %23 = arith.mulf %20, %22 : vector<32x128xf32>
    %c0_10 = arith.constant 0 : index
    %c0_11 = arith.constant 0 : index
    %24 = vector.load %arg3[%c0_10, %c0_11] : memref<32x1xf32, #tpu.memory_space<vmem>>, vector<32x1xf32>
    %25 = vector.broadcast %24 : vector<32x1xf32> to vector<32x128xf32>
    %26 = arith.addf %23, %25 : vector<32x128xf32>
    %cst_12 = arith.constant 0.000000e+00 : f32
    %27 = vector.broadcast %cst_12 : f32 to vector<32x128xf32>
    %28 = arith.cmpf ogt, %26, %27 : vector<32x128xf32>
    %cst_13 = arith.constant 0.00999999977 : f32
    %29 = vector.broadcast %cst_13 : f32 to vector<32x128xf32>
    %30 = arith.mulf %29, %26 : vector<32x128xf32>
    %31 = arith.select %28, %26, %30 : vector<32x128xi1>, vector<32x128xf32>
    %32 = arith.truncf %31 : vector<32x128xf32> to vector<32x128xbf16>
    %c0_14 = arith.constant 0 : index
    %c0_15 = arith.constant 0 : index
    %33 = vector.load %arg4[%c0_14, %c0_15] : memref<32x128xbf16, #tpu.memory_space<vmem>>, vector<32x128xbf16>
    tpu.vector_store %arg4[%c0_14, %c0_15], %32 {strides = array<i32>} : memref<32x128xbf16, #tpu.memory_space<vmem>>, vector<32x128xbf16>,
    return
  }
}

module attributes {stable_mosaic.version = 11 : i64} {
  func.func @_conv_bn_lrelu_kernel(%arg0: memref<288x32xbf16, #tpu.memory_space<vmem>>, %arg1: memref<64x288xbf16, #tpu.memory_space<vmem>>, %arg2: memref<64x1xf32, #tpu.memory_space<vmem>>, %arg3: memref<64x1xf32, #tpu.memory_space<vmem>>, %arg4: memref<64x32xbf16, #tpu.memory_space<vmem>>) attributes {dimension_semantics = [], scalar_prefetch = 0 : i64, scratch_operands = 0 : i64, tpu.core_type = #tpu.core_type<tc>} {
    %c0 = arith.constant 0 : index
    %c0_0 = arith.constant 0 : index
    %0 = vector.load %arg1[%c0, %c0_0] : memref<64x288xbf16, #tpu.memory_space<vmem>>, vector<64x288xbf16>
    %c0_1 = arith.constant 0 : index
    %c0_2 = arith.constant 0 : index
    %1 = vector.load %arg0[%c0_1, %c0_2] : memref<288x32xbf16, #tpu.memory_space<vmem>>, vector<288x32xbf16>
    %cst = arith.constant dense<0.000000e+00> : vector<64x32xf32>
    %2 = tpu.matmul %0, %1, %cst {dimension_numbers = #tpu.dot_dimension_numbers<[1], [0], [0], [1], [0, 0, 1, 1], [], []>} : vector<64x288xbf16>, vector<288x32xbf16>, vector<64x32xf32> -> vector<64x32xf32>
    %cst_3 = arith.constant dense<0.000000e+00> : vector<64xf32>
    %3 = vector.multi_reduction <add>, %2, %cst_3 [1] : vector<64x32xf32> to vector<64xf32>
    %4 = vector.shape_cast %3 : vector<64xf32> to vector<64x1xf32>
    %cst_4 = arith.constant 3.200000e+01 : f32
    %5 = vector.broadcast %cst_4 : f32 to vector<64x1xf32>
    %6 = arith.divf %4, %5 : vector<64x1xf32>
    %7 = vector.broadcast %6 : vector<64x1xf32> to vector<64x32xf32>
    %8 = arith.subf %2, %7 : vector<64x32xf32>
    %9 = arith.mulf %8, %8 : vector<64x32xf32>
    %cst_5 = arith.constant dense<0.000000e+00> : vector<64xf32>
    %10 = vector.multi_reduction <add>, %9, %cst_5 [1] : vector<64x32xf32> to vector<64xf32>
    %11 = vector.shape_cast %10 : vector<64xf32> to vector<64x1xf32>
    %cst_6 = arith.constant 3.200000e+01 : f32
    %12 = vector.broadcast %cst_6 : f32 to vector<64x1xf32>
    %13 = arith.divf %11, %12 : vector<64x1xf32>
    %14 = vector.broadcast %6 : vector<64x1xf32> to vector<64x32xf32>
    %15 = arith.subf %2, %14 : vector<64x32xf32>
    %cst_7 = arith.constant 9.99999974E-6 : f32
    %16 = vector.broadcast %cst_7 : f32 to vector<64x1xf32>
    %17 = arith.addf %13, %16 : vector<64x1xf32>
    %18 = math.rsqrt %17 : vector<64x1xf32>
    %19 = vector.broadcast %18 : vector<64x1xf32> to vector<64x32xf32>
    %20 = arith.mulf %15, %19 : vector<64x32xf32>
    %c0_8 = arith.constant 0 : index
    %c0_9 = arith.constant 0 : index
    %21 = vector.load %arg2[%c0_8, %c0_9] : memref<64x1xf32, #tpu.memory_space<vmem>>, vector<64x1xf32>
    %22 = vector.broadcast %21 : vector<64x1xf32> to vector<64x32xf32>
    %23 = arith.mulf %20, %22 : vector<64x32xf32>
    %c0_10 = arith.constant 0 : index
    %c0_11 = arith.constant 0 : index
    %24 = vector.load %arg3[%c0_10, %c0_11] : memref<64x1xf32, #tpu.memory_space<vmem>>, vector<64x1xf32>
    %25 = vector.broadcast %24 : vector<64x1xf32> to vector<64x32xf32>
    %26 = arith.addf %23, %25 : vector<64x32xf32>
    %cst_12 = arith.constant 0.000000e+00 : f32
    %27 = vector.broadcast %cst_12 : f32 to vector<64x32xf32>
    %28 = arith.cmpf ogt, %26, %27 : vector<64x32xf32>
    %cst_13 = arith.constant 0.00999999977 : f32
    %29 = vector.broadcast %cst_13 : f32 to vector<64x32xf32>
    %30 = arith.mulf %29, %26 : vector<64x32xf32>
    %31 = arith.select %28, %26, %30 : vector<64x32xi1>, vector<64x32xf32>
    %32 = arith.truncf %31 : vector<64x32xf32> to vector<64x32xbf16>
    %c0_14 = arith.constant 0 : index
    %c0_15 = arith.constant 0 : index
    %33 = vector.load %arg4[%c0_14, %c0_15] : memref<64x32xbf16, #tpu.memory_space<vmem>>, vector<64x32xbf16>
    tpu.vector_store %arg4[%c0_14, %c0_15], %32 {strides = array<i32>} : memref<64x32xbf16, #tpu.memory_space<vmem>>, vector<64x32xbf16>,
    return
  }
}

module attributes {stable_mosaic.version = 11 : i64} {
  func.func @_tail_kernel(%arg0: i32, %arg1: memref<2x512xbf16, #tpu.memory_space<vmem>>, %arg2: memref<8x512xbf16, #tpu.memory_space<vmem>>, %arg3: memref<1x512xf32, #tpu.memory_space<vmem>>, %arg4: memref<512x512xbf16, #tpu.memory_space<vmem>>, %arg5: memref<512x512xbf16, #tpu.memory_space<vmem>>, %arg6: memref<2x8xf32, #tpu.memory_space<vmem>>, %arg7: memref<1x512xf32, #tpu.memory_space<vmem>>, %arg8: memref<512x32xbf16, #tpu.memory_space<vmem>>, %arg9: memref<1x32xf32, #tpu.memory_space<vmem>>, %arg10: memref<2x16xf32, #tpu.memory_space<vmem>>, %arg11: memref<2x16xf32, #tpu.memory_space<vmem>>, %arg12: memref<2x16xf32, #tpu.memory_space<vmem>>, %arg13: memref<2x16xf32, #tpu.memory_space<vmem>>, %arg14: memref<2x512xf32, #tpu.memory_space<vmem>>) attributes {dimension_semantics = [#tpu.dimension_semantics<arbitrary>], iteration_bounds = array<i64: 2>, scalar_prefetch = 0 : i64, scratch_operands = 1 : i64, tpu.core_type = #tpu.core_type<tc>, window_params = [{transform_indices = @transform_0, window_bounds = array<i64: 2, 512>}, {transform_indices = @transform_1, window_bounds = array<i64: 8, 512>}, {transform_indices = @transform_2, window_bounds = array<i64: 1, 512>}, {transform_indices = @transform_3, window_bounds = array<i64: 512, 512>}, {transform_indices = @transform_4, window_bounds = array<i64: 512, 512>}, {pipeline_mode = #tpu.pipeline_mode<synchronous>, transform_indices = @transform_5, window_bounds = array<i64: 2, 8>}, {pipeline_mode = #tpu.pipeline_mode<synchronous>, transform_indices = @transform_6, window_bounds = array<i64: 1, 512>}, {pipeline_mode = #tpu.pipeline_mode<synchronous>, transform_indices = @transform_7, window_bounds = array<i64: 512, 32>}, {pipeline_mode = #tpu.pipeline_mode<synchronous>, transform_indices = @transform_8, window_bounds = array<i64: 1, 32>}, {pipeline_mode = #tpu.pipeline_mode<synchronous>, transform_indices = @transform_9, window_bounds = array<i64: 2, 16>}, {pipeline_mode = #tpu.pipeline_mode<synchronous>, transform_indices = @transform_10, window_bounds = array<i64: 2, 16>}, {pipeline_mode = #tpu.pipeline_mode<synchronous>, transform_indices = @transform_11, window_bounds = array<i64: 2, 16>}, {pipeline_mode = #tpu.pipeline_mode<synchronous>, transform_indices = @transform_12, window_bounds = array<i64: 2, 16>}]} {
    %c0_i32 = arith.constant 0 : i32
    %0 = arith.cmpi eq, %arg0, %c0_i32 : i32
    %1 = arith.extui %0 : i1 to i32
    %c0_i32_0 = arith.constant 0 : i32
    %2 = arith.cmpi ne, %1, %c0_i32_0 : i32
    scf.if %2 {
      %cst_20 = arith.constant 0.000000e+00 : f32
      %25 = vector.broadcast %cst_20 : f32 to vector<2x512xf32>
      %c0_21 = arith.constant 0 : index
      %c0_22 = arith.constant 0 : index
      %26 = vector.load %arg14[%c0_21, %c0_22] : memref<2x512xf32, #tpu.memory_space<vmem>>, vector<2x512xf32>
      tpu.vector_store %arg14[%c0_21, %c0_22], %25 {strides = array<i32>} : memref<2x512xf32, #tpu.memory_space<vmem>>, vector<2x512xf32>,
    } else {
    }
    %c0 = arith.constant 0 : index
    %c0_1 = arith.constant 0 : index
    %3 = vector.load %arg6[%c0, %c0_1] : memref<2x8xf32, #tpu.memory_space<vmem>>, vector<2x8xf32>
    %4 = arith.truncf %3 : vector<2x8xf32> to vector<2x8xbf16>
    %c0_2 = arith.constant 0 : index
    %c0_3 = arith.constant 0 : index
    %5 = vector.load %arg2[%c0_2, %c0_3] : memref<8x512xbf16, #tpu.memory_space<vmem>>, vector<8x512xbf16>
    %cst = arith.constant dense<0.000000e+00> : vector<2x512xf32>
    %6 = tpu.matmul %4, %5, %cst {dimension_numbers = #tpu.dot_dimension_numbers<[1], [0], [0], [1], [0, 0, 1, 1], [], []>} : vector<2x8xbf16>, vector<8x512xbf16>, vector<2x512xf32> -> vector<2x512xf32>
    %c0_4 = arith.constant 0 : index
    %c0_5 = arith.constant 0 : index
    %7 = vector.load %arg3[%c0_4, %c0_5] : memref<1x512xf32, #tpu.memory_space<vmem>>, vector<1x512xf32>
    %8 = vector.broadcast %7 : vector<1x512xf32> to vector<2x512xf32>
    %9 = arith.addf %6, %8 : vector<2x512xf32>
    %cst_6 = arith.constant 0.000000e+00 : f32
    %10 = vector.broadcast %cst_6 : f32 to vector<2x512xf32>
    %11 = arith.maximumf %9, %10 : vector<2x512xf32>
    %c0_7 = arith.constant 0 : index
    %c0_8 = arith.constant 0 : index
    %12 = vector.load %arg14[%c0_7, %c0_8] : memref<2x512xf32, #tpu.memory_space<vmem>>, vector<2x512xf32>
    %c0_9 = arith.constant 0 : index
    %c0_10 = arith.constant 0 : index
    %13 = vector.load %arg1[%c0_9, %c0_10] : memref<2x512xbf16, #tpu.memory_space<vmem>>, vector<2x512xbf16>
    %c0_11 = arith.constant 0 : index
    %c0_12 = arith.constant 0 : index
    %14 = vector.load %arg4[%c0_11, %c0_12] : memref<512x512xbf16, #tpu.memory_space<vmem>>, vector<512x512xbf16>
    %cst_13 = arith.constant dense<0.000000e+00> : vector<2x512xf32>
    %15 = tpu.matmul %13, %14, %cst_13 {dimension_numbers = #tpu.dot_dimension_numbers<[1], [0], [0], [1], [0, 0, 1, 1], [], []>} : vector<2x512xbf16>, vector<512x512xbf16>, vector<2x512xf32> -> vector<2x512xf32>
    %16 = arith.truncf %11 : vector<2x512xf32> to vector<2x512xbf16>
    %c0_14 = arith.constant 0 : index
    %c0_15 = arith.constant 0 : index
    %17 = vector.load %arg5[%c0_14, %c0_15] : memref<512x512xbf16, #tpu.memory_space<vmem>>, vector<512x512xbf16>
    %cst_16 = arith.constant dense<0.000000e+00> : vector<2x512xf32>
    %18 = tpu.matmul %16, %17, %cst_16 {dimension_numbers = #tpu.dot_dimension_numbers<[1], [0], [0], [1], [0, 0, 1, 1], [], []>} : vector<2x512xbf16>, vector<512x512xbf16>, vector<2x512xf32> -> vector<2x512xf32>
    %19 = arith.addf %15, %18 : vector<2x512xf32>
    %20 = arith.addf %12, %19 : vector<2x512xf32>
    %c0_17 = arith.constant 0 : index
    %c0_18 = arith.constant 0 : index
    %21 = vector.load %arg14[%c0_17, %c0_18] : memref<2x512xf32, #tpu.memory_space<vmem>>, vector<2x512xf32>
    tpu.vector_store %arg14[%c0_17, %c0_18], %20 {strides = array<i32>} : memref<2x512xf32, #tpu.memory_space<vmem>>, vector<2x512xf32>,
    %c1_i32 = arith.constant 1 : i32
    %22 = arith.cmpi eq, %arg0, %c1_i32 : i32
    %23 = arith.extui %22 : i1 to i32
    %c0_i32_19 = arith.constant 0 : i32
    %24 = arith.cmpi ne, %23, %c0_i32_19 : i32
    scf.if %24 {
      %c0_20 = arith.constant 0 : index
      %c0_21 = arith.constant 0 : index
      %25 = vector.load %arg14[%c0_20, %c0_21] : memref<2x512xf32, #tpu.memory_space<vmem>>, vector<2x512xf32>
      %c0_22 = arith.constant 0 : index
      %c0_23 = arith.constant 0 : index
      %26 = vector.load %arg7[%c0_22, %c0_23] : memref<1x512xf32, #tpu.memory_space<vmem>>, vector<1x512xf32>
      %27 = vector.broadcast %26 : vector<1x512xf32> to vector<2x512xf32>
      %28 = arith.addf %25, %27 : vector<2x512xf32>
      %cst_24 = arith.constant 0.000000e+00 : f32
      %29 = vector.broadcast %cst_24 : f32 to vector<2x512xf32>
      %30 = arith.maximumf %28, %29 : vector<2x512xf32>
      %31 = arith.truncf %30 : vector<2x512xf32> to vector<2x512xbf16>
      %c0_25 = arith.constant 0 : index
      %c0_26 = arith.constant 0 : index
      %32 = vector.load %arg8[%c0_25, %c0_26] : memref<512x32xbf16, #tpu.memory_space<vmem>>, vector<512x32xbf16>
      %cst_27 = arith.constant dense<0.000000e+00> : vector<2x32xf32>
      %33 = tpu.matmul %31, %32, %cst_27 {dimension_numbers = #tpu.dot_dimension_numbers<[1], [0], [0], [1], [0, 0, 1, 1], [], []>} : vector<2x512xbf16>, vector<512x32xbf16>, vector<2x32xf32> -> vector<2x32xf32>
      %c0_28 = arith.constant 0 : index
      %c0_29 = arith.constant 0 : index
      %34 = vector.load %arg9[%c0_28, %c0_29] : memref<1x32xf32, #tpu.memory_space<vmem>>, vector<1x32xf32>
      %35 = vector.broadcast %34 : vector<1x32xf32> to vector<2x32xf32>
      %36 = arith.addf %33, %35 : vector<2x32xf32>
      %37 = vector.extract_strided_slice %36 {offsets = [0, 0], sizes = [2, 16], strides = [1, 1]} : vector<2x32xf32> to vector<2x16xf32>
      %38 = vector.extract_strided_slice %36 {offsets = [0, 16], sizes = [2, 16], strides = [1, 1]} : vector<2x32xf32> to vector<2x16xf32>
      %cst_30 = arith.constant -1.000000e+01 : f32
      %cst_31 = arith.constant 1.000000e+01 : f32
      %39 = vector.broadcast %cst_30 : f32 to vector<2x16xf32>
      %40 = arith.maximumf %39, %38 : vector<2x16xf32>
      %41 = vector.broadcast %cst_31 : f32 to vector<2x16xf32>
      %42 = arith.minimumf %41, %40 : vector<2x16xf32>
      %c0_32 = arith.constant 0 : index
      %c0_33 = arith.constant 0 : index
      %43 = vector.load %arg11[%c0_32, %c0_33] : memref<2x16xf32, #tpu.memory_space<vmem>>, vector<2x16xf32>
      tpu.vector_store %arg11[%c0_32, %c0_33], %37 {strides = array<i32>} : memref<2x16xf32, #tpu.memory_space<vmem>>, vector<2x16xf32>,
      %c0_34 = arith.constant 0 : index
      %c0_35 = arith.constant 0 : index
      %44 = vector.load %arg12[%c0_34, %c0_35] : memref<2x16xf32, #tpu.memory_space<vmem>>, vector<2x16xf32>
      tpu.vector_store %arg12[%c0_34, %c0_35], %42 {strides = array<i32>} : memref<2x16xf32, #tpu.memory_space<vmem>>, vector<2x16xf32>,
      %cst_36 = arith.constant 5.000000e-01 : f32
      %45 = vector.broadcast %cst_36 : f32 to vector<2x16xf32>
      %46 = arith.mulf %45, %42 : vector<2x16xf32>
      %47 = math.exp %46 : vector<2x16xf32>
      %c0_37 = arith.constant 0 : index
      %c0_38 = arith.constant 0 : index
      %48 = vector.load %arg10[%c0_37, %c0_38] : memref<2x16xf32, #tpu.memory_space<vmem>>, vector<2x16xf32>
      %49 = arith.mulf %47, %48 : vector<2x16xf32>
      %50 = arith.addf %37, %49 : vector<2x16xf32>
      %c0_39 = arith.constant 0 : index
      %c0_40 = arith.constant 0 : index
      %51 = vector.load %arg13[%c0_39, %c0_40] : memref<2x16xf32, #tpu.memory_space<vmem>>, vector<2x16xf32>
      tpu.vector_store %arg13[%c0_39, %c0_40], %50 {strides = array<i32>} : memref<2x16xf32, #tpu.memory_space<vmem>>, vector<2x16xf32>,
    } else {
    }
    return
  }
  func.func @transform_0(%arg0: i32) -> (i32, i32) {
    %c0_i32 = arith.constant 0 : i32
    %c0_i32_0 = arith.constant 0 : i32
    return %c0_i32, %arg0 : i32, i32
  }
  func.func @transform_1(%arg0: i32) -> (i32, i32) {
    %c0_i32 = arith.constant 0 : i32
    %c0_i32_0 = arith.constant 0 : i32
    return %c0_i32, %arg0 : i32, i32
  }
  func.func @transform_2(%arg0: i32) -> (i32, i32) {
    %c0_i32 = arith.constant 0 : i32
    %c0_i32_0 = arith.constant 0 : i32
    return %c0_i32, %arg0 : i32, i32
  }
  func.func @transform_3(%arg0: i32) -> (i32, i32) {
    %c0_i32 = arith.constant 0 : i32
    %c0_i32_0 = arith.constant 0 : i32
    return %arg0, %c0_i32 : i32, i32
  }
  func.func @transform_4(%arg0: i32) -> (i32, i32) {
    %c0_i32 = arith.constant 0 : i32
    %c0_i32_0 = arith.constant 0 : i32
    return %arg0, %c0_i32 : i32, i32
  }
  func.func @transform_5(%arg0: i32) -> (i32, i32) {
    %c0_i32 = arith.constant 0 : i32
    %c0_i32_0 = arith.constant 0 : i32
    %c0_i32_1 = arith.constant 0 : i32
    return %c0_i32, %c0_i32_0 : i32, i32
  }
  func.func @transform_6(%arg0: i32) -> (i32, i32) {
    %c0_i32 = arith.constant 0 : i32
    %c0_i32_0 = arith.constant 0 : i32
    %c0_i32_1 = arith.constant 0 : i32
    return %c0_i32, %c0_i32_0 : i32, i32
  }
  func.func @transform_7(%arg0: i32) -> (i32, i32) {
    %c0_i32 = arith.constant 0 : i32
    %c0_i32_0 = arith.constant 0 : i32
    %c0_i32_1 = arith.constant 0 : i32
    return %c0_i32, %c0_i32_0 : i32, i32
  }
  func.func @transform_8(%arg0: i32) -> (i32, i32) {
    %c0_i32 = arith.constant 0 : i32
    %c0_i32_0 = arith.constant 0 : i32
    %c0_i32_1 = arith.constant 0 : i32
    return %c0_i32, %c0_i32_0 : i32, i32
  }
  func.func @transform_9(%arg0: i32) -> (i32, i32) {
    %c0_i32 = arith.constant 0 : i32
    %c0_i32_0 = arith.constant 0 : i32
    %c0_i32_1 = arith.constant 0 : i32
    return %c0_i32, %c0_i32_0 : i32, i32
  }
  func.func @transform_10(%arg0: i32) -> (i32, i32) {
    %c0_i32 = arith.constant 0 : i32
    %c0_i32_0 = arith.constant 0 : i32
    %c0_i32_1 = arith.constant 0 : i32
    return %c0_i32, %c0_i32_0 : i32, i32
  }
  func.func @transform_11(%arg0: i32) -> (i32, i32) {
    %c0_i32 = arith.constant 0 : i32
    %c0_i32_0 = arith.constant 0 : i32
    %c0_i32_1 = arith.constant 0 : i32
    return %c0_i32, %c0_i32_0 : i32, i32
  }
  func.func @transform_12(%arg0: i32) -> (i32, i32) {
    %c0_i32 = arith.constant 0 : i32
    %c0_i32_0 = arith.constant 0 : i32
    %c0_i32_1 = arith.constant 0 : i32
    return %c0_i32, %c0_i32_0 : i32, i32
  }
}

</mosaic_0001>

<bundles_post_ra>
// kernel: encoder_forward.3
= control target key start
LH: loop header
LB: loop body
LE: loop exit
PB: predicated region body
PF: predicated region fallthrough
CT: control target
= control target key end

     0   :  { %vm46_vm0 = vcmask 1043456   ;;  %vm47_vm1 = vcmask 1044480   ;;  %vm39_vm2 = vcmask 72704   ;;  %v287_v1 = vmov 65535   ;;  %s353_s0 = inlined_call_operand.vmem [shape: bf16[9,128], index: 0, kind: input, shape index: {}]   ;;  %s354_s1 = inlined_call_operand.vmem [shape: bf16[32,9], index: 1, kind: input, shape index: {}]   ;;  %s355_s2 = inlined_call_operand.vmem [shape: f32[32,1], index: 2, kind: input, shape index: {}]   ;;  %s356_s3 = inlined_call_operand.vmem [shape: f32[32,1], index: 3, kind: input, shape index: {}]   ;;  %s357_s4 = inlined_call_operand.vmem [shape: bf16[32,128], index: 4, kind: output, shape index: {}]  }
   0x1   :  { %v276_v0 = vld [vmem:[%s353_s0] sm:$0x1f]   ;;  %v48_v2 = vsel %vm46_vm0, 4294967295, %v287_v1  ;;  %v278_v6 = vld [vmem:[%s354_s1 + $0x8] sm:$0xff]   ;;  %v288_v7 = vmov 0   ;;  %v149_v13 = vld [vmem:[%s355_s2 + $0x10] sm:$0xff] }
   0x2   :  { %v277_v3 = vld [vmem:[%s354_s1] sm:$0xff]   ;;  %v49_v4 = vsel %vm47_vm1, %v48_v2, 0  ;;  %275 = vset.pattern.permute.xlu1 %v288_v7  ;;  %274 = vset.pattern.permute.xlu0 %v288_v7  ;;  %v148_v12 = vld [vmem:[%s355_s2 + $0x8] sm:$0xff]  ;;  %v150_v14 = vld [vmem:[%s355_s2 + $0x18] sm:$0xff] }
   0x3   :  { %v51_v5 = vand.u32 %v276_v0, %v49_v4  ;;  %268 = vmatprep.mubr.msk.bf16.mxu0 %vm39_vm2, %v277_v3  ;;  %v175_v15 = vld [vmem:[%s356_s3] sm:$0xff]  ;;  %v176_v16 = vld [vmem:[%s356_s3 + $0x8] sm:$0xff]  ;;  %v177_v17 = vld [vmem:[%s356_s3 + $0x10] sm:$0xff] }
   0x4   :  { %v178_v34 = vld [vmem:[%s356_s3 + $0x18] sm:$0xff]  ;;  %v147_v35 = vld [vmem:[%s355_s2] sm:$0xff] }
   0x5   :  { %266 = vmatprep.subr.bf16.mxu0 %v51_v5 }
   0x6   :  { %267 = vmatpush3.bf16.msra.mxu0 %v51_v5 }
   0x9   :  { %269 = vmatmul.mubr.msk.bf16.vlgmr.msra.gmra.mxu0 %vm39_vm2, %v278_v6 }
  0xc9   :  { %v270_v8 = vpop.f32.mrf.mxu0 }
  0xca   :  { %106 = vadd.xlane.f32.xlu1 %v270_v8 }
  0xcb   :  { %v87_v9 = vpop.f32.mrf.mxu0 }
  0xcc   :  { %102 = vadd.xlane.f32.xlu0 %v87_v9 }
  0xcd   :  { %v271_v10 = vpop.f32.mrf.mxu0 }
  0xce   :  { %108 = vadd.xlane.f32.xlu1 %v271_v10 }
  0xcf   :  { %v90_v11 = vpop.f32.mrf.mxu0 }
  0xd0   :  { %104 = vadd.xlane.f32.xlu0 %v90_v11 }
  0xdf   :  { %158 = vperm.xlu1 %275, %v148_v12  }
  0xe3   :  { %163 = vperm.xlu1 %275, %v149_v13  }
  0xe7   :  { %168 = vperm.xlu1 %275, %v150_v14  }
  0xeb   :  { %181 = vperm.xlu1 %275, %v175_v15  }
  0xef   :  { %186 = vperm.xlu1 %275, %v176_v16  }
  0xf3   :  { %191 = vperm.xlu1 %275, %v177_v17  }
 0x153   :  { %v107_v18 = vpop.xlane.xlu1 %106 }
 0x154   :  { %v113_v19 = vmul.f32 0.0078125, %v107_v18 }
 0x155   :  { %v103_v20 = vpop.xlane.xlu0 %102 }
 0x156   :  { %v117_v21 = vsub.f32 %v270_v8, %v113_v19  ;;  %v111_v22 = vmul.f32 0.0078125, %v103_v20 }
 0x157   :  { %v109_v23 = vpop.xlane.xlu1 %108 }
 0x158   :  { %v115_v24 = vsub.f32 %v87_v9, %v111_v22  ;;  %v114_v25 = vmul.f32 0.0078125, %v109_v23  ;;  %v121_v26 = vmul.f32 %v117_v21, %v117_v21 }
 0x159   :  { %v105_v27 = vpop.xlane.xlu0 %104 }
 0x15a   :  { %v118_v28 = vsub.f32 %v271_v10, %v114_v25  ;;  %v112_v29 = vmul.f32 0.0078125, %v105_v27  ;;  %127 = vadd.xlane.f32.xlu0 %v121_v26  ;;  %v119_v32 = vmul.f32 %v115_v24, %v115_v24 }
 0x15b   :  { %v159_v36 = vpop.permute.xlu1 %158 }
 0x15c   :  { %v116_v30 = vsub.f32 %v90_v11, %v112_v29  ;;  %v122_v31 = vmul.f32 %v118_v28, %v118_v28 }
 0x15e   :  { %129 = vadd.xlane.f32.xlu1 %v122_v31  ;;  %123 = vadd.xlane.f32.xlu0 %v119_v32  ;;  %v120_v33 = vmul.f32 %v116_v30, %v116_v30 }
 0x15f   :  { %v164_v37 = vpop.permute.xlu1 %163 }
 0x162   :  { %125 = vadd.xlane.f32.xlu1 %v120_v33 }
 0x163   :  { %v169_v38 = vpop.permute.xlu1 %168 }
 0x167   :  { %v182_v39 = vpop.permute.xlu1 %181 }
 0x16b   :  { %v187_v40 = vpop.permute.xlu1 %186 }
 0x16f   :  { %v192_v41 = vpop.permute.xlu1 %191 }
 0x173   :  { %196 = vperm.xlu1 %275, %v178_v34  }
 0x174   :  { %153 = vperm.xlu0 %274, %v147_v35  }
 0x1e3   :  { %v128_v42 = vpop.xlane.xlu0 %127 }
 0x1e4   :  { %v133_v43 = vmul.f32 0.0078125, %v128_v42 }
 0x1e6   :  { %v137_v44 = vadd.f32 1e-05, %v133_v43 }
 0x1e7   :  { %v130_v45 = vpop.xlane.xlu1 %129  ;;  %v124_v46 = vpop.xlane.xlu0 %123 }
 0x1e8   :  { %279 = vrsqrt.f32 %v137_v44  ;;  %v134_v47 = vmul.f32 0.0078125, %v130_v45  ;;  %v131_v48 = vmul.f32 0.0078125, %v124_v46 }
 0x1ea   :  { %v138_v49 = vadd.f32 1e-05, %v134_v47  ;;  %v135_v50 = vadd.f32 1e-05, %v131_v48 }
 0x1eb   :  { %v126_v51 = vpop.xlane.xlu1 %125 }
 0x1ec   :  { %281 = vrsqrt.f32 %v138_v49  ;;  %v132_v52 = vmul.f32 0.0078125, %v126_v51 }
 0x1ed   :  { %283 = vrsqrt.f32 %v135_v50 }
 0x1ee   :  { %v136_v53 = vadd.f32 1e-05, %v132_v52 }
 0x1ef   :  { %v154_v61 = vpop.permute.xlu0 %153  ;;  %v197_v1 = vpop.permute.xlu1 %196 }
 0x1f0   :  { %285 = vrsqrt.f32 %v136_v53 }
 0x1f5   :  { %v280_v54 = vpop.eup %279 }
 0x1f6   :  { %v145_v55 = vmul.f32 %v280_v54, %v117_v21 }
 0x1f8   :  { %v173_v56 = vmul.f32 %v164_v37, %v145_v55 }
 0x1f9   :  { %v282_v57 = vpop.eup %281 }
 0x1fa   :  { %v284_v58 = vpop.eup %283  ;;  %v146_v59 = vmul.f32 %v282_v57, %v118_v28  ;;  %v201_v60 = vadd.f32 %v192_v41, %v173_v56 }
 0x1fb   :  { %v143_v62 = vmul.f32 %v284_v58, %v115_v24 }
 0x1fc   :  { %v174_v63 = vmul.f32 %v169_v38, %v146_v59  ;;  %v209_v5 = vmul.f32 0.01, %v201_v60  ;;  %vm205_vm3 = vcmp.gt.f32.partialorder %v201_v60, 0.0 }
 0x1fd   :  { %v286_v0 = vpop.eup %285  ;;  %v171_v2 = vmul.f32 %v154_v61, %v143_v62 }
 0x1fe   :  { %v144_v3 = vmul.f32 %v286_v0, %v116_v30  ;;  %v202_v4 = vadd.f32 %v197_v1, %v174_v63  ;;  %v213_v9 = vsel %vm205_vm3, %v201_v60, %v209_v5 }
 0x1ff   :  { %v199_v6 = vadd.f32 %v182_v39, %v171_v2 }
 0x200   :  { %vm206_vm4 = vcmp.gt.f32.partialorder %v202_v4, 0.0  ;;  %v210_v7 = vmul.f32 0.01, %v202_v4  ;;  %v172_v8 = vmul.f32 %v159_v36, %v144_v3 }
 0x201   :  { %v207_v12 = vmul.f32 0.01, %v199_v6  ;;  %vm203_vm5 = vcmp.gt.f32.partialorder %v199_v6, 0.0 }
 0x202   :  { %v214_v10 = vsel %vm206_vm4, %v202_v4, %v210_v7  ;;  %v200_v11 = vadd.f32 %v187_v40, %v172_v8 }
 0x203   :  { %v260_v13 = vpack.c.bf16 %v214_v10, %v213_v9  ;;  %v211_v16 = vsel %vm203_vm5, %v199_v6, %v207_v12 }
 0x204   :  { %vm204_vm6 = vcmp.gt.f32.partialorder %v200_v11, 0.0  ;;  %v208_v14 = vmul.f32 0.01, %v200_v11 }
 0x205   :  { %262 = vst [vmem:[%s357_s4 + $0x8] sm:$0xff] %v260_v13  }
 0x206   :  { %v212_v15 = vsel %vm204_vm6, %v200_v11, %v208_v14 }
 0x207   :  { %v255_v17 = vpack.c.bf16 %v212_v15, %v211_v16 }
 0x209   :  { %256 = vst [vmem:[%s357_s4] sm:$0xff] %v255_v17  }

// kernel: encoder_forward.4
= control target key start
LH: loop header
LB: loop body
LE: loop exit
PB: predicated region body
PF: predicated region fallthrough
CT: control target
= control target key end

     0   :  { %vm238_vm0 = vcmask 261120   ;;  %v844_v30 = vmov 0   ;;  %vm654_vm2 = vcmask 257024   ;;  %s1145_s0 = inlined_call_operand.vmem [shape: bf16[288,32], index: 0, kind: input, shape index: {}]   ;;  %s1146_s1 = inlined_call_operand.vmem [shape: bf16[64,288], index: 1, kind: input, shape index: {}]   ;;  %s1147_s2 = inlined_call_operand.vmem [shape: f32[64,1], index: 2, kind: input, shape index: {}]   ;;  %s1148_s3 = inlined_call_operand.vmem [shape: f32[64,1], index: 3, kind: input, shape index: {}]   ;;  %s1149_s4 = inlined_call_operand.vmem [shape: bf16[64,32], index: 4, kind: output, shape index: {}]  }
   0x1   :  { %v794_v0 = vld [vmem:[%s1145_s0 + $0x78] sm:$0xff]   ;;  %v796_v2 = vld [vmem:[%s1145_s0 + $0x70] sm:$0xff]   ;;  %v798_v4 = vld [vmem:[%s1145_s0 + $0x68] sm:$0xff]   ;;  %793 = vset.pattern.permute.xlu1 %v844_v30  ;;  %792 = vset.pattern.permute.xlu0 %v844_v30 }
   0x2   :  { %v795_v1 = vld [vmem:[%s1145_s0 + $0x38] sm:$0xff]   ;;  %717 = vmatprep.subr.bf16.mxu0 %v794_v0  ;;  %775 = vmatprep.subr.bf16.mxu1 %v794_v0  ;;  %v797_v3 = vld [vmem:[%s1145_s0 + $0x30] sm:$0xff]   ;;  %v799_v5 = vld [vmem:[%s1145_s0 + $0x28] sm:$0xff]  }
   0x3   :  { %718 = vmatpush3.bf16.msra.mxu0 %v795_v1  ;;  %783 = vmatpush3.bf16.msra.mxu1 %v795_v1  ;;  %v800_v6 = vld [vmem:[%s1145_s0 + $0x60] sm:$0xff]   ;;  %v802_v8 = vld [vmem:[%s1145_s0 + $0x58] sm:$0xff]   ;;  %v804_v10 = vld [vmem:[%s1145_s0 + $0x50] sm:$0xff]  }
   0x4   :  { %719 = vmatprep.subr.bf16.mxu0 %v796_v2  ;;  %776 = vmatprep.subr.bf16.mxu1 %v796_v2  ;;  %v801_v7 = vld [vmem:[%s1145_s0 + $0x20] sm:$0xff]   ;;  %v803_v9 = vld [vmem:[%s1145_s0 + $0x18] sm:$0xff]   ;;  %v805_v13 = vld [vmem:[%s1145_s0 + $0x10] sm:$0xff]  }
   0x5   :  { %v812_v11 = vld [vmem:[%s1146_s1 + $0x4] ss:$12 sps:$4 sm:$0xff]   ;;  %v815_v12 = vld [vmem:[%s1146_s1 + $0x4c] ss:$12 sps:$4 sm:$0xff]   ;;  %v813_v20 = vld [vmem:[%s1146_s1 + $0x48] ss:$12 sps:$4 sm:$0xff]  }
   0x6   :  { %v806_v14 = vld [vmem:[%s1145_s0 + $0x48] sm:$0xff]   ;;  %283 = vmatprep.mubr.bf16.mxu0 %v812_v11  ;;  %307 = vmatprep.mubr.bf16.mxu1 %v815_v12  ;;  %v808_v16 = vld [vmem:[%s1145_s0 + $0x40] sm:$0xff]   ;;  %v824_v28 = vld [vmem:[%s1146_s1 + $0x50] ss:$12 sps:$4 sm:$0xff]  }
   0x7   :  { %720 = vmatpush3.bf16.msra.mxu0 %v797_v3  ;;  %784 = vmatpush3.bf16.msra.mxu1 %v797_v3  ;;  %v807_v15 = vld [vmem:[%s1145_s0 + $0x8] sm:$0xff]   ;;  %v809_v17 = vld [vmem:[%s1145_s0] sm:$0xff]   ;;  %v827_v29 = vld [vmem:[%s1146_s1 + $0x30] ss:$12 sps:$4 sm:$0xff]  }
   0x8   :  { %721 = vmatprep.subr.bf16.mxu0 %v798_v4  ;;  %777 = vmatprep.subr.bf16.mxu1 %v798_v4  ;;  %v816_v18 = vld [vmem:[%s1145_s0 + $0x88] sm:$0xff]   ;;  %v817_v22 = vld [vmem:[%s1145_s0 + $0x80] sm:$0xff]  }
   0x9   :  { %v810_v19 = vld [vmem:[%s1146_s1] ss:$12 sps:$4 sm:$0xff]   ;;  %v818_v21 = vld [vmem:[%s1146_s1 + $0x1c] ss:$12 sps:$4 sm:$0xff]   ;;  %v821_v24 = vld [vmem:[%s1146_s1 + $0x18] ss:$12 sps:$4 sm:$0xff]  }
   0xa   :  { %v820_v23 = vld [vmem:[%s1146_s1 + $0x8] ss:$12 sps:$4 sm:$0xff]   ;;  %v822_v25 = vld [vmem:[%s1146_s1 + $0x20] ss:$12 sps:$4 sm:$0xff]   ;;  %v823_v26 = vld [vmem:[%s1146_s1 + $0x38] ss:$12 sps:$4 sm:$0xff]  }
   0xb   :  { %722 = vmatpush3.bf16.msra.mxu0 %v799_v5  ;;  %785 = vmatpush3.bf16.msra.mxu1 %v799_v5  ;;  %v825_v27 = vld [vmem:[%s1146_s1 + $0x34] ss:$12 sps:$4 sm:$0xff]   ;;  %v543_v11 = vld [vmem:[%s1148_s3 + $0x8] sm:$0xff] }
   0xc   :  { %723 = vmatprep.subr.bf16.mxu0 %v800_v6  ;;  %778 = vmatprep.subr.bf16.mxu1 %v800_v6  ;;  %v487_v6 = vld [vmem:[%s1147_s2 + $0x8] sm:$0xff] }
   0xd   :  { %v491_v12 = vld [vmem:[%s1147_s2 + $0x28] sm:$0xff] }
   0xf   :  { %724 = vmatpush3.bf16.msra.mxu0 %v801_v7  ;;  %786 = vmatpush3.bf16.msra.mxu1 %v801_v7  ;;  %v488_v7 = vld [vmem:[%s1147_s2 + $0x10] sm:$0xff] }
  0x10   :  { %725 = vmatprep.subr.bf16.mxu0 %v802_v8  ;;  %779 = vmatprep.subr.bf16.mxu1 %v802_v8  ;;  %v489_v8 = vld [vmem:[%s1147_s2 + $0x18] sm:$0xff] }
  0x13   :  { %726 = vmatpush3.bf16.msra.mxu0 %v803_v9  ;;  %787 = vmatpush3.bf16.msra.mxu1 %v803_v9  ;;  %v486_v9 = vld [vmem:[%s1147_s2] sm:$0xff] }
  0x14   :  { %727 = vmatprep.subr.bf16.mxu0 %v804_v10  ;;  %780 = vmatprep.subr.bf16.mxu1 %v804_v10  ;;  %v490_v10 = vld [vmem:[%s1147_s2 + $0x20] sm:$0xff] }
  0x17   :  { %728 = vmatpush3.bf16.msra.mxu0 %v805_v13  ;;  %788 = vmatpush3.bf16.msra.mxu1 %v805_v13  ;;  %v545_v13 = vld [vmem:[%s1148_s3 + $0x18] sm:$0xff] }
  0x18   :  { %729 = vmatprep.subr.bf16.mxu0 %v806_v14  ;;  %781 = vmatprep.subr.bf16.mxu1 %v806_v14  ;;  %v492_v14 = vld [vmem:[%s1147_s2 + $0x30] sm:$0xff] }
  0x1b   :  { %730 = vmatpush3.bf16.msra.mxu0 %v807_v15  ;;  %789 = vmatpush3.bf16.msra.mxu1 %v807_v15  ;;  %v547_v15 = vld [vmem:[%s1148_s3 + $0x28] sm:$0xff] }
  0x1c   :  { %731 = vmatprep.subr.bf16.mxu0 %v808_v16  ;;  %782 = vmatprep.subr.bf16.mxu1 %v808_v16  ;;  %v493_v16 = vld [vmem:[%s1147_s2 + $0x38] sm:$0xff] }
  0x1f   :  { %732 = vmatpush3.bf16.msra.mxu0 %v809_v17  ;;  %790 = vmatpush3.bf16.msra.mxu1 %v809_v17 }
  0x20   :  { %763 = vmatprep.subr.bf16.mxu1 %v816_v18 }
  0x22   :  { %284 = vmatmul.mubr.bf16.vlgmr.msra.gmra.mxu0 %v810_v19  ;;  %308 = vmatmul.mubr.bf16.vlgmr.msra.gmra.mxu1 %v813_v20 }
  0x23   :  { %764 = vmatpush3.bf16.msra.mxu1 %v816_v18  ;;  %291 = vmatprep.mubr.bf16.mxu0 %v818_v21 }
  0x24   :  { %765 = vmatprep.subr.bf16.mxu1 %v817_v22  ;;  %767 = vmatprep.mubr.msk.bf16.mxu1 %vm238_vm0, %v820_v23 }
  0x27   :  { %766 = vmatpush3.bf16.msra.mxu1 %v817_v22 }
  0x2a   :  { %292 = vmatmul.mubr.bf16.gmra.mxu0 %v821_v24  ;;  %768 = vmatmul.mubr.msk.bf16.vlgmr.msra.gmra.mxu1 %vm238_vm0, %v822_v25 }
  0x2b   :  { %771 = vmatprep.mubr.msk.bf16.mxu1 %vm238_vm0, %v823_v26  ;;  %299 = vmatprep.mubr.bf16.mxu0 %v825_v27  ;;  %v542_v26 = vld [vmem:[%s1148_s3] sm:$0xff]  ;;  %v544_v27 = vld [vmem:[%s1148_s3 + $0x10] sm:$0xff] }
  0x32   :  { %772 = vmatmul.mubr.msk.bf16.gmra.mxu1 %vm238_vm0, %v824_v28  ;;  %300 = vmatmul.mubr.bf16.gmra.mxu0 %v827_v29  ;;  %v546_v28 = vld [vmem:[%s1148_s3 + $0x20] sm:$0xff] }
  0xe2   :  { %v733_v31 = vpop.f32.mrf.mxu0  ;;  %v751_v32 = vpop.f32.mrf.mxu1 }
  0xe4   :  { %v734_v33 = vpop.f32.mrf.mxu0  ;;  %v752_v34 = vpop.f32.mrf.mxu1 }
  0xe5   :  { %v735_v42 = vadd.f32 %v734_v33, %v733_v31  ;;  %v753_v54 = vadd.f32 %v752_v34, %v751_v32 }
  0xe6   :  { %v736_v35 = vpop.f32.mrf.mxu0  ;;  %v754_v36 = vpop.f32.mrf.mxu1 }
  0xe8   :  { %v737_v37 = vpop.f32.mrf.mxu0  ;;  %v755_v38 = vpop.f32.mrf.mxu1 }
  0xe9   :  { %v964_v39 = vadd.f32 %v755_v38, %v754_v36  ;;  %v738_v49 = vadd.f32 %v737_v37, %v736_v35 }
  0xea   :  { %v739_v40 = vpop.f32.mrf.mxu0  ;;  %v769_v41 = vpop.f32.mrf.mxu1 }
  0xec   :  { %v740_v43 = vpop.f32.mrf.mxu0  ;;  %v350_v44 = vpop.f32.mrf.mxu1 }
  0xed   :  { %v741_v45 = vadd.f32 %v740_v43, %v739_v40  ;;  %v966_v46 = vadd.f32 %v735_v42, %v350_v44 }
  0xee   :  { %v742_v47 = vpop.f32.mrf.mxu0  ;;  %v770_v48 = vpop.f32.mrf.mxu1 }
  0xef   :  { %v381_v50 = vsel %vm238_vm0, %v966_v46, 0.0  ;;  %v970_v51 = vadd.f32 %v769_v41, %v741_v45 }
  0xf0   :  { %v743_v52 = vpop.f32.mrf.mxu0  ;;  %v353_v53 = vpop.f32.mrf.mxu1  ;;  %382 = vadd.xlane.f32.xlu0 %v381_v50 }
  0xf1   :  { %v744_v55 = vadd.f32 %v743_v52, %v742_v47  ;;  %v972_v56 = vadd.f32 %v738_v49, %v353_v53  ;;  %v387_v57 = vsel %vm238_vm0, %v970_v51, 0.0 }
  0xf2   :  { %v773_v58 = vpop.f32.mrf.mxu1  ;;  %388 = vadd.xlane.f32.xlu1 %v387_v57  ;;  %v745_v59 = vpop.f32.mrf.mxu0 }
  0xf3   :  { %v976_v60 = vadd.f32 %v773_v58, %v753_v54  ;;  %v384_v61 = vsel %vm238_vm0, %v972_v56, 0.0  ;;  %v980_v62 = vadd.f32 %v770_v48, %v744_v55 }
  0xf4   :  { %385 = vadd.xlane.f32.xlu0 %v384_v61  ;;  %v746_v63 = vpop.f32.mrf.mxu0  ;;  %v366_v2 = vpop.f32.mrf.mxu1 }
  0xf5   :  { %v747_v0 = vadd.f32 %v746_v63, %v745_v59  ;;  %v390_v1 = vsel %vm238_vm0, %v980_v62, 0.0  ;;  %v399_v3 = vsel %vm238_vm0, %v976_v60, 0.0  ;;  %v549_v59 = vld [vmem:[%s1148_s3 + $0x38] sm:$0xff] }
  0xf6   :  { %391 = vadd.xlane.f32.xlu1 %v390_v1  ;;  %v748_v17 = vpop.f32.mrf.mxu0  ;;  %v774_v18 = vpop.f32.mrf.mxu1 }
  0xf7   :  { %v986_v4 = vadd.f32 %v747_v0, %v366_v2  ;;  %v378_v20 = vadd.f32 %v774_v18, %v964_v39 }
  0xf8   :  { %400 = vadd.xlane.f32.xlu0 %v399_v3  ;;  %v749_v19 = vpop.f32.mrf.mxu0  ;;  %v369_v22 = vpop.f32.mrf.mxu1 }
  0xf9   :  { %v393_v5 = vsel %vm238_vm0, %v986_v4, 0.0  ;;  %v750_v21 = vadd.f32 %v749_v19, %v748_v17  ;;  %v402_v24 = vsel %vm238_vm0, %v378_v20, 0.0 }
  0xfb   :  { %v370_v23 = vadd.f32 %v750_v21, %v369_v22 }
  0xfc   :  { %394 = vadd.xlane.f32.xlu0 %v393_v5 }
  0xfd   :  { %v396_v25 = vsel %vm238_vm0, %v370_v23, 0.0 }
 0x107   :  { %501 = vperm.xlu1 %793, %v487_v6  }
 0x10b   :  { %506 = vperm.xlu1 %793, %v488_v7  }
 0x10f   :  { %511 = vperm.xlu1 %793, %v489_v8  }
 0x112   :  { %496 = vperm.xlu0 %792, %v486_v9  }
 0x113   :  { %516 = vperm.xlu1 %793, %v490_v10  }
 0x116   :  { %557 = vperm.xlu0 %792, %v543_v11  }
 0x117   :  { %521 = vperm.xlu1 %793, %v491_v12  }
 0x11a   :  { %567 = vperm.xlu0 %792, %v545_v13   ;;  %v548_v13 = vld [vmem:[%s1148_s3 + $0x30] sm:$0xff] }
 0x11b   :  { %526 = vperm.xlu1 %793, %v492_v14  }
 0x11e   :  { %577 = vperm.xlu0 %792, %v547_v15  }
 0x11f   :  { %531 = vperm.xlu1 %793, %v493_v16  }
 0x143   :  { %403 = vadd.xlane.f32.xlu1 %v402_v24 }
 0x147   :  { %397 = vadd.xlane.f32.xlu1 %v396_v25 }
 0x158   :  { %552 = vperm.xlu1 %793, %v542_v26  }
 0x15c   :  { %562 = vperm.xlu1 %793, %v544_v27  }
 0x160   :  { %572 = vperm.xlu1 %793, %v546_v28  }
 0x179   :  { %v383_v29 = vpop.xlane.xlu0 %382 }
 0x17a   :  { %v406_v30 = vmul.f32 0.03125, %v383_v29 }
 0x17b   :  { %v389_v31 = vpop.xlane.xlu1 %388 }
 0x17c   :  { %v1036_v32 = vsub.f32 %v966_v46, %v406_v30  ;;  %v408_v33 = vmul.f32 0.03125, %v389_v31 }
 0x17d   :  { %v386_v34 = vpop.xlane.xlu0 %385 }
 0x17e   :  { %v1039_v35 = vsub.f32 %v970_v51, %v408_v33  ;;  %v407_v36 = vmul.f32 0.03125, %v386_v34  ;;  %v422_v37 = vmul.f32 %v1036_v32, %v1036_v32 }
 0x17f   :  { %v392_v38 = vpop.xlane.xlu1 %391 }
 0x180   :  { %v1044_v39 = vsub.f32 %v972_v56, %v407_v36  ;;  %v409_v40 = vmul.f32 0.03125, %v392_v38  ;;  %v430_v41 = vsel %vm238_vm0, %v422_v37, 0.0  ;;  %v424_v42 = vmul.f32 %v1039_v35, %v1039_v35 }
 0x181   :  { %431 = vadd.xlane.f32.xlu0 %v430_v41  ;;  %v401_v43 = vpop.xlane.xlu0 %400 }
 0x182   :  { %v1050_v44 = vsub.f32 %v980_v62, %v409_v40  ;;  %v412_v45 = vmul.f32 0.03125, %v401_v43  ;;  %v423_v46 = vmul.f32 %v1044_v39, %v1044_v39  ;;  %v436_v48 = vsel %vm238_vm0, %v424_v42, 0.0 }
 0x184   :  { %v1055_v47 = vsub.f32 %v976_v60, %v412_v45  ;;  %v433_v49 = vsel %vm238_vm0, %v423_v46, 0.0  ;;  %v425_v50 = vmul.f32 %v1050_v44, %v1050_v44  ;;  %v502_v60 = vpop.permute.xlu1 %501 }
 0x185   :  { %437 = vadd.xlane.f32.xlu0 %v436_v48  ;;  %434 = vadd.xlane.f32.xlu1 %v433_v49  ;;  %v395_v51 = vpop.xlane.xlu0 %394 }
 0x186   :  { %v410_v52 = vmul.f32 0.03125, %v395_v51  ;;  %v428_v53 = vmul.f32 %v1055_v47, %v1055_v47  ;;  %v439_v55 = vsel %vm238_vm0, %v425_v50, 0.0 }
 0x188   :  { %v1064_v54 = vsub.f32 %v986_v4, %v410_v52  ;;  %v448_v56 = vsel %vm238_vm0, %v428_v53, 0.0  ;;  %v507_v61 = vpop.permute.xlu1 %506 }
 0x189   :  { %440 = vadd.xlane.f32.xlu1 %v439_v55  ;;  %449 = vadd.xlane.f32.xlu0 %v448_v56 }
 0x18a   :  { %v426_v57 = vmul.f32 %v1064_v54, %v1064_v54 }
 0x18c   :  { %v442_v58 = vsel %vm238_vm0, %v426_v57, 0.0  ;;  %v1074_v62 = vpop.permute.xlu1 %511 }
 0x18d   :  { %443 = vadd.xlane.f32.xlu0 %v442_v58  ;;  %v497_v14 = vpop.permute.xlu0 %496 }
 0x190   :  { %v1076_v63 = vpop.permute.xlu1 %516 }
 0x191   :  { %v558_v15 = vpop.permute.xlu0 %557 }
 0x194   :  { %v1078_v0 = vpop.permute.xlu1 %521 }
 0x195   :  { %v568_v17 = vpop.permute.xlu0 %567 }
 0x198   :  { %v1080_v1 = vpop.permute.xlu1 %526 }
 0x199   :  { %v1097_v19 = vpop.permute.xlu0 %577 }
 0x19c   :  { %v1082_v2 = vpop.permute.xlu1 %531 }
 0x1a3   :  { %587 = vperm.xlu0 %792, %v549_v59  }
 0x1cc   :  { %v404_v3 = vpop.xlane.xlu1 %403 }
 0x1cd   :  { %v413_v4 = vmul.f32 0.03125, %v404_v3 }
 0x1cf   :  { %v1084_v5 = vsub.f32 %v378_v20, %v413_v4 }
 0x1d0   :  { %v398_v6 = vpop.xlane.xlu1 %397 }
 0x1d1   :  { %v411_v7 = vmul.f32 0.03125, %v398_v6  ;;  %v429_v8 = vmul.f32 %v1084_v5, %v1084_v5 }
 0x1d3   :  { %v1088_v9 = vsub.f32 %v370_v23, %v411_v7  ;;  %v451_v10 = vsel %vm238_vm0, %v429_v8, 0.0 }
 0x1d4   :  { %452 = vadd.xlane.f32.xlu1 %v451_v10  ;;  %v553_v16 = vpop.permute.xlu1 %552 }
 0x1d5   :  { %v427_v11 = vmul.f32 %v1088_v9, %v1088_v9 }
 0x1d7   :  { %v445_v12 = vsel %vm238_vm0, %v427_v11, 0.0 }
 0x1d8   :  { %446 = vadd.xlane.f32.xlu1 %v445_v12  ;;  %v563_v18 = vpop.permute.xlu1 %562 }
 0x1dc   :  { %v573_v20 = vpop.permute.xlu1 %572 }
 0x1e9   :  { %582 = vperm.xlu1 %793, %v548_v13  }
 0x20a   :  { %v432_v21 = vpop.xlane.xlu0 %431 }
 0x20b   :  { %v454_v22 = vmul.f32 0.03125, %v432_v21 }
 0x20d   :  { %v462_v23 = vadd.f32 1e-05, %v454_v22 }
 0x20e   :  { %v435_v24 = vpop.xlane.xlu1 %434  ;;  %v438_v25 = vpop.xlane.xlu0 %437 }
 0x20f   :  { %828 = vrsqrt.f32 %v462_v23  ;;  %v455_v26 = vmul.f32 0.03125, %v435_v24  ;;  %v456_v27 = vmul.f32 0.03125, %v438_v25 }
 0x211   :  { %v463_v28 = vadd.f32 1e-05, %v455_v26  ;;  %v464_v29 = vadd.f32 1e-05, %v456_v27 }
 0x212   :  { %v441_v30 = vpop.xlane.xlu1 %440  ;;  %v450_v31 = vpop.xlane.xlu0 %449 }
 0x213   :  { %830 = vrsqrt.f32 %v463_v28  ;;  %v457_v33 = vmul.f32 0.03125, %v441_v30 }
 0x214   :  { %832 = vrsqrt.f32 %v464_v29 }
 0x215   :  { %v465_v34 = vadd.f32 1e-05, %v457_v33 }
 0x216   :  { %v444_v36 = vpop.xlane.xlu0 %443 }
 0x217   :  { %834 = vrsqrt.f32 %v465_v34  ;;  %v458_v37 = vmul.f32 0.03125, %v444_v36 }
 0x219   :  { %v466_v38 = vadd.f32 1e-05, %v458_v37 }
 0x21b   :  { %836 = vrsqrt.f32 %v466_v38 }
 0x21c   :  { %v829_v40 = vpop.eup %828 }
 0x21d   :  { %v478_v41 = vmul.f32 %v829_v40, %v1036_v32 }
 0x21e   :  { %v588_v36 = vpop.permute.xlu0 %587 }
 0x21f   :  { %v534_v42 = vmul.f32 %v497_v14, %v478_v41  ;;  %v460_v14 = vmul.f32 0.03125, %v450_v31 }
 0x220   :  { %v831_v43 = vpop.eup %830 }
 0x221   :  { %v833_v45 = vpop.eup %832  ;;  %v590_v46 = vadd.f32 %v553_v16, %v534_v42  ;;  %v479_v48 = vmul.f32 %v831_v43, %v1044_v39 }
 0x222   :  { %v480_v49 = vmul.f32 %v833_v45, %v1039_v35 }
 0x223   :  { %vm598_vm1 = vcmp.gt.f32.partialorder %v590_v46, 0.0  ;;  %v606_v50 = vmul.f32 0.01, %v590_v46  ;;  %v535_v51 = vmul.f32 %v502_v60, %v479_v48 }
 0x224   :  { %v835_v52 = vpop.eup %834  ;;  %v536_v53 = vmul.f32 %v507_v61, %v480_v49 }
 0x225   :  { %v614_v55 = vsel %vm598_vm1, %v590_v46, %v606_v50  ;;  %v591_v56 = vadd.f32 %v558_v15, %v535_v51  ;;  %v481_v57 = vmul.f32 %v835_v52, %v1050_v44  ;;  %v468_v15 = vadd.f32 1e-05, %v460_v14 }
 0x226   :  { %v709_v58 = vpack.c.bf16 %v614_v55, %v614_v55  ;;  %v592_v32 = vadd.f32 %v563_v18, %v536_v53 }
 0x227   :  { %vm599_vm3 = vcmp.gt.f32.partialorder %v591_v56, 0.0  ;;  %v607_v59 = vmul.f32 0.01, %v591_v56  ;;  %v537_v3 = vmul.f32 %v1074_v62, %v481_v57  ;;  %838 = vrsqrt.f32 %v468_v15 }
 0x228   :  { %v837_v4 = vpop.eup %836  ;;  %vm600_vm4 = vcmp.gt.f32.partialorder %v592_v32, 0.0  ;;  %v608_v39 = vmul.f32 0.01, %v592_v32  ;;  %655 = vst.msk [vmem:[%s1149_s4] sm:$0xf] %vm654_vm2, %v709_v58 }
 0x229   :  { %v615_v35 = vsel %vm599_vm3, %v591_v56, %v607_v59  ;;  %v593_v60 = vadd.f32 %v568_v17, %v537_v3  ;;  %v482_v61 = vmul.f32 %v837_v4, %v1064_v54 }
 0x22a   :  { %v710_v44 = vpack.c.bf16 %v615_v35, %v615_v35  ;;  %v616_v6 = vsel %vm600_vm4, %v592_v32, %v608_v39 }
 0x22b   :  { %v711_v7 = vpack.c.bf16 %v616_v6, %v616_v6  ;;  %vm601_vm5 = vcmp.gt.f32.partialorder %v593_v60, 0.0  ;;  %v609_v8 = vmul.f32 0.01, %v593_v60  ;;  %v538_v10 = vmul.f32 %v1076_v63, %v482_v61 }
 0x22c   :  { %656 = vst.msk [vmem:[%s1149_s4 + $0x4] sm:$0xf] %vm654_vm2, %v710_v44 }
 0x22d   :  { %v617_v62 = vsel %vm601_vm5, %v593_v60, %v609_v8  ;;  %v594_v11 = vadd.f32 %v573_v20, %v538_v10  ;;  %657 = vst.msk [vmem:[%s1149_s4 + $0x8] sm:$0xf] %vm654_vm2, %v711_v7 }
 0x22e   :  { %v712_v54 = vpack.c.bf16 %v617_v62, %v617_v62 }
 0x22f   :  { %vm602_vm6 = vcmp.gt.f32.partialorder %v594_v11, 0.0  ;;  %v610_v12 = vmul.f32 0.01, %v594_v11 }
 0x230   :  { %658 = vst.msk [vmem:[%s1149_s4 + $0xc] sm:$0xf] %vm654_vm2, %v712_v54 }
 0x231   :  { %v618_v63 = vsel %vm602_vm6, %v594_v11, %v610_v12 }
 0x232   :  { %v713_v13 = vpack.c.bf16 %v618_v63, %v618_v63 }
 0x234   :  { %659 = vst.msk [vmem:[%s1149_s4 + $0x10] sm:$0xf] %vm654_vm2, %v713_v13  ;;  %v839_v16 = vpop.eup %838 }
 0x235   :  { %v484_v21 = vmul.f32 %v839_v16, %v1055_v47 }
 0x237   :  { %v540_v25 = vmul.f32 %v1080_v1, %v484_v21 }
 0x25d   :  { %v453_v17 = vpop.xlane.xlu1 %452 }
 0x25e   :  { %v461_v18 = vmul.f32 0.03125, %v453_v17 }
 0x260   :  { %v469_v20 = vadd.f32 1e-05, %v461_v18 }
 0x261   :  { %v447_v22 = vpop.xlane.xlu1 %446 }
 0x262   :  { %840 = vrsqrt.f32 %v469_v20  ;;  %v459_v23 = vmul.f32 0.03125, %v447_v22 }
 0x264   :  { %v467_v24 = vadd.f32 1e-05, %v459_v23 }
 0x265   :  { %v583_v26 = vpop.permute.xlu1 %582 }
 0x266   :  { %842 = vrsqrt.f32 %v467_v24  ;;  %v596_v27 = vadd.f32 %v583_v26, %v540_v25 }
 0x268   :  { %vm604_vm7 = vcmp.gt.f32.partialorder %v596_v27, 0.0  ;;  %v612_v28 = vmul.f32 0.01, %v596_v27 }
 0x26a   :  { %v620_v29 = vsel %vm604_vm7, %v596_v27, %v612_v28 }
 0x26b   :  { %v715_v30 = vpack.c.bf16 %v620_v29, %v620_v29 }
 0x26d   :  { %661 = vst.msk [vmem:[%s1149_s4 + $0x18] sm:$0xf] %vm654_vm2, %v715_v30 }
 0x26f   :  { %v841_v31 = vpop.eup %840 }
 0x270   :  { %v485_v47 = vmul.f32 %v841_v31, %v1084_v5 }
 0x272   :  { %v541_v33 = vmul.f32 %v1082_v2, %v485_v47 }
 0x273   :  { %v843_v34 = vpop.eup %842 }
 0x274   :  { %v597_v1 = vadd.f32 %v588_v36, %v541_v33  ;;  %v483_v37 = vmul.f32 %v843_v34, %v1088_v9 }
 0x276   :  { %vm605_vm8 = vcmp.gt.f32.partialorder %v597_v1, 0.0  ;;  %v613_v38 = vmul.f32 0.01, %v597_v1  ;;  %v539_v40 = vmul.f32 %v1078_v0, %v483_v37 }
 0x278   :  { %v621_v41 = vsel %vm605_vm8, %v597_v1, %v613_v38  ;;  %v595_v42 = vadd.f32 %v1097_v19, %v539_v40 }
 0x279   :  { %v716_v43 = vpack.c.bf16 %v621_v41, %v621_v41 }
 0x27a   :  { %vm603_vm9 = vcmp.gt.f32.partialorder %v595_v42, 0.0  ;;  %v611_v45 = vmul.f32 0.01, %v595_v42 }
 0x27b   :  { %662 = vst.msk [vmem:[%s1149_s4 + $0x1c] sm:$0xf] %vm654_vm2, %v716_v43 }
 0x27c   :  { %v619_v2 = vsel %vm603_vm9, %v595_v42, %v611_v45 }
 0x27d   :  { %v714_v5 = vpack.c.bf16 %v619_v2, %v619_v2 }
 0x27f   :  { %660 = vst.msk [vmem:[%s1149_s4 + $0x14] sm:$0xf] %vm654_vm2, %v714_v5 }

// kernel: encoder_forward.5
= control target key start
LH: loop header
LB: loop body
LE: loop exit
PB: predicated region body
PF: predicated region fallthrough
CT: control target
= control target key end

     0   :  { %s4829_s0 = inlined_call_operand.vmem [shape: bf16[2,1024], index: 0, kind: input, shape index: {}]   ;;  %s4830_s1 = inlined_call_operand.vmem [shape: bf16[8,1024], index: 1, kind: input, shape index: {}]   ;;  %s4831_s2 = inlined_call_operand.vmem [shape: f32[1,1024], index: 2, kind: input, shape index: {}]   ;;  %s4832_s3 = inlined_call_operand.vmem [shape: bf16[1024,512], index: 3, kind: input, shape index: {}]   ;;  %s4833_s4 = inlined_call_operand.hbm [shape: bf16[1024,512], index: 4, kind: input, shape index: {}]   ;;  %s4834_s5 = inlined_call_operand.vmem [shape: f32[2,8], index: 5, kind: input, shape index: {}]   ;;  %s4835_s6 = inlined_call_operand.vmem [shape: f32[1,512], index: 6, kind: input, shape index: {}]   ;;  %s4836_s7 = inlined_call_operand.vmem [shape: bf16[512,32], index: 7, kind: input, shape index: {}]   ;;  %s4837_s8 = inlined_call_operand.vmem [shape: f32[1,32], index: 8, kind: input, shape index: {}]   ;;  %s4838_s9 = inlined_call_operand.vmem [shape: f32[2,16], index: 9, kind: input, shape index: {}]   ;;  %s4839_s10 = inlined_call_operand.hbm [shape: f32[2,16], index: 10, kind: output, shape index: {0}]   ;;  %s4840_s11 = inlined_call_operand.hbm [shape: f32[2,16], index: 11, kind: output, shape index: {1}]   ;;  %s4841_s12 = inlined_call_operand.hbm [shape: f32[2,16], index: 12, kind: output, shape index: {2}]  }
   0x1   :  { %4845 = sst [smem:[#allocation16_spill]] %s4833_s4 }
   0x2   :  { %18 = vsyncpa [#allocation4], 0 }
   0x3   :  { %20 = vsyncpa [#allocation4 + $0x1], 0 }
   0x4   :  { %21 = vsyncpa [#allocation5], 0 }
   0x5   :  { %22 = vsyncpa [#allocation8], 0  ;;  %s4232_s21 = smov 0   ;;  %s4234_s22 = smov 0  }
   0x6   :  { %s4236_s23 = smov 0   ;;  %s4238_s24 = smov 0  }
   0x7 LB: > { %4846 = sst [smem:[#allocation13_spill]] %s4145_s22  ;;  %s4251_s25 = sadd.s32 4294967295, %s4153_s24   ;;  %s4153_s24 = sphi %s4238_s24, %s4857_s24   ;;  %s4149_s23 = sphi %s4236_s23, %s4856_s23   ;;  %s4145_s22 = sphi %s4234_s22, %s4855_s22   ;;  %s4141_s21 = sphi %s4232_s21, %s4854_s21  }
   0x8   : > { %4847 = sst [smem:[#allocation14_spill]] %s4149_s23  ;;  %s4254_s26 = sadd.s32 1, %s4153_s24  }
   0x9   : > { %s136_s27 = ssub.s32 %s4153_s24, %s4254_s26  ;;  %s139_s28 = sadd.s32 1, %s4149_s23 }
   0xa   : > { %p137_p0 = scmp.eq.s32.totalorder %s136_s27, 0  ;;  %p146_p1 = scmp.ne.s32.totalorder %s4149_s23, %s4145_s22 }
   0xb   : > { %p147_p2 = scmp.eq.s32.totalorder %s4153_s24, 0  ;;  %p152_p3 = scmp.ne.s32.totalorder %s4145_s22, %s4141_s21 }
   0xc   : > { %s4264_s29 = scalar_select %p137_p0, %s4149_s23, %s139_s28  }
   0xd   : > { %p148_p4 = por %p147_p2, %p146_p1  ;;  %p153_p5 = scmp.eq.s32.totalorder %s4251_s25, 0 }
   0xe   : > { %4848 = sst [smem:[#allocation15_spill]] %s4264_s29  ;;  %p3539_p6 = scmp.lt.s32.totalorder %s4153_s24, 2 }
   0xf   : > { %p4268_p7 = por %p153_p5, %p152_p3  ;;  %s394_s13 = sand.u32 1, %s4149_s23  }
  0x10   : > { %s3152_s14 = sshll.u32 %s394_s13, 10  ;;  %s3475_s15 = sshll.u32 %s4153_s24, 14 }
  0x11   : > { %s4849_s30 = scalar_select %p4268_p7, 1, 0 }
  0x12   : > { %s4850_s4 = sld [smem:[#allocation16_spill]]  ;;  %s398_s19 = scalar_lea.vmem [#allocation3], %s3152_s14 }
  0x13   : > { %s406_s20 = sshll.u32 %s398_s19, 4  ;;  %p4281_p8 = pnand %p3539_p6, %p148_p4  ;;  %s4279_s20 = int_to_ptr.vmem [resolvable:$true] %s406_s20 }
  0x14   : > { %s4286_s27 = scalar_lea.sflag [#allocation4], %s394_s13 }
  0x15   : > { %p4013_p11 = pneg %p4281_p8 }
  0x18   : > { %s4277_s18 = scalar_lea.hbm %s4850_s4, %s3475_s15  ;;  %s4016_s14 = scalar_lea.hbm %s4850_s4, 32768 }
  0x19   : > { %s4011_s28 = scalar_lea.hbm %s4277_s18, 16384  ;;  %p4017_p0 = scmp.lt.s32.totalorder %s4277_s18, %s4850_s4 }
  0x1a   : > { %p4012_p10 = scmp.ne.s32.totalorder %s4277_s18, %s4011_s28  ;;  %p4018_p1 = scmp.lt.s32.totalorder %s4016_s14, %s4011_s28 }
  0x1c   : > { %p4014_p12 = pnand %p4013_p11, %p4012_p10  ;;  %p4019_p2 = por %p4018_p1, %p4017_p0 }
  0x1e   : > { %p4015_p13 = pneg %p4014_p12 }
  0x20   : > { %p4020_p3 = pnand %p4019_p2, %p4015_p13 }
  0x22   : > { %4023 = shalt.err (!%p4020_p3)
}
  0x23   : > { %s4024_s13 = scalar_lea.vmem %s4279_s20, 16384  ;;  %s4155_s29 = smov [#allocation3]  }
  0x24   : > { %p4025_p4 = scmp.ne.s32.totalorder %s4279_s20, %s4024_s13  ;;  %s4029_s23 = sshll.u32 %s4155_s29, 4  ;;  %s4030_s23 = int_to_ptr.vmem [resolvable:$false] %s4029_s23 }
  0x25   : > { %s4031_s15 = scalar_lea.vmem %s4030_s23, 32768  ;;  %p4032_p10 = scmp.lt.s32.totalorder %s4279_s20, %s4030_s23 }
  0x26   : > { %p4027_p5 = pnand %p4025_p4, %p4013_p11  ;;  %p4033_p12 = scmp.lt.s32.totalorder %s4031_s15, %s4024_s13 }
  0x28   : > { %p4028_p6 = pneg %p4027_p5  ;;  %p4034_p9 = por %p4033_p12, %p4032_p10 }
  0x2a   : > { %p4035_p7 = pnand %p4034_p9, %p4028_p6 }
  0x2c   : > { %4038 = shalt.err (!%p4035_p7)
}
  0x2d   : > { %s4156_s28 = smov 256   ;;  %s4157_s16 = smov 16  }
  0x2e   : > { %3538 = dma.hbm_to_vmem [thread:$0]  (!%p4281_p8), %s4277_s18, 16384, %s4279_s20, %s4286_s27, %s4156_s28, %s4156_s28, %s4157_s16  }
  0x2f   : > { %p414_p11 = scmp.lt.s32.totalorder %s4153_s24, 3  ;;  %p4852_p13 = scmp.ge.s32.totalorder %s4153_s24, 1 }
  0x31   : > { %p415_p0 = pnand %p4852_p13, %p414_p11 }
  0x32   : > { %s420_s23 = sand.u32 (!%p415_p0), 1, %s4145_s22   ;;  %p4853_p7 = scmp.ne.s32.totalorder (!%p415_p0), %s4849_s30, 0 }
  0x33   : > { %418 = sbr.rel (%p415_p0) target bundleno = 1095 (0x447), region = 60  ;;  %s3157_s29 = sshll.u32 (!%p415_p0), %s420_s23, 10 }
  0x34   : > { %s421_s14 = scalar_lea.sflag (!%p415_p0), [#allocation4], %s420_s23  ;;  %s4311_s17 = scalar_lea.vmem (!%p415_p0), [#allocation3], %s3157_s29 }
  0x38   : > { %4128 = dma.done.wait (%p4853_p7), %s421_s14, 16384  }
  0x39   : > { %4130 = vsyncadd (%p4853_p7), %s421_s14, 4294950912  ;;  %s3158_s21 = sshll.u32 %s4251_s25, 2  ;;  %s3162_s18 = sshll.u32 %s4251_s25, 6 }
  0x3a   : > { %p480_p8 = scmp.lt.s32.totalorder %s3158_s21, 7  ;;  %p496_p9 = scmp.lt.s32.totalorder %s3162_s18, 127 }
  0x3b   : > { %p3165_p1 = scmp.ne.s32.totalorder %s4251_s25, 0 }
  0x3c   : > { %s4859_s21 = smov (!%p480_p8, %s3158_s21), 7  ;;  %s4861_s18 = smov (!%p496_p9, %s3162_s18), 127 }
  0x3d   : > { %s482_s27 = scalar_lea.vmem %s4829_s0, %s4859_s21  ;;  %s3160_s19 = sshll.u32 %s4859_s21, 2 }
  0x3e   : > { %s488_s15 = scalar_lea.vmem %s4830_s1, %s3160_s19  ;;  %s493_s23 = scalar_lea.vmem %s4831_s2, %s4859_s21 }
  0x3f   : > { %s3476_s29 = sshll.u32 %s4861_s18, 4  ;;  %507 = sbr.rel (%p3165_p1) target bundleno = 70 (0x46), region = 68 }
  0x40   : > { %s4336_s22 = scalar_lea.vmem %s4832_s3, %s3476_s29 }
  0x44   : > { %v4158_v0 = vmov 0.0  }
  0x45   : > { %508 = vst [vmem:[#allocation2] sm:$0xff] %v4158_v0 }
  0x46 PF: > { %v511_v1 = vld [vmem:[%s488_s15] sm:$0xff]  ;;  %vm549_vm0 = vcmask 1043456   ;;  %v512_v2 = vld [vmem:[%s488_s15 + $0x8] sm:$0xff]  ;;  %v4159_v8 = vmov 0   ;;  %vm545_vm1 = vcmask 64512   ;;  %p3431_p2 = scmp.ne.s32.totalorder %s4251_s25, 1 }
  0x47   : > { %v509_v3 = vld [vmem:[%s4834_s5] sm:$0x3]  ;;  %v3167_v4 = vcombine.high %v511_v1, %v511_v1  ;;  %v3169_v5 = vcombine.high %v512_v2, %v512_v2  ;;  %v3166_v6 = vcombine.low %v511_v1, %v511_v1  ;;  %v3168_v7 = vcombine.low %v512_v2, %v512_v2  ;;  %594 = vmatprep.mubr.bf16.mxu0 %v4159_v8  ;;  %v3595_v9 = vld [vmem:[%s4311_s17 + $0xe4] ss:$16 sps:$4 sm:$0xff]   ;;  %v3593_v13 = vld [vmem:[%s4311_s17 + $0xe0] ss:$16 sps:$4 sm:$0xff]  }
  0x48   : > { %635 = vmatprep.mubr.bf16.mxu1 %v4159_v8  ;;  %v510_v12 = vpack.c.bf16 %v509_v3, %v509_v3  ;;  %v3598_v14 = vld [vmem:[%s4311_s17 + $0x2e4] ss:$16 sps:$4 sm:$0xff]   ;;  %v3596_v15 = vld [vmem:[%s4311_s17 + $0x2e0] ss:$16 sps:$4 sm:$0xff]  }
  0x49   : > { %3170 = vmatprep.subr.msk.bf16.mxu0 %vm549_vm0, %v3167_v4  ;;  %3172 = vmatprep.subr.msk.bf16.mxu1 %vm549_vm0, %v3169_v5  ;;  %v551_v10 = vsel %vm549_vm0, %v3166_v6, 0  ;;  %v557_v11 = vsel %vm549_vm0, %v3168_v7, 0  ;;  %v3601_v16 = vld [vmem:[%s4311_s17 + $0xc4] ss:$16 sps:$4 sm:$0xff]   ;;  %v3599_v18 = vld [vmem:[%s4311_s17 + $0xc0] ss:$16 sps:$4 sm:$0xff]  }
  0x4a   : > { %577 = vmatpush1.bf16.msra.mxu0 %v551_v10  ;;  %618 = vmatpush1.bf16.msra.mxu1 %v557_v11  ;;  %v3604_v17 = vld [vmem:[%s4311_s17 + $0x2c4] ss:$16 sps:$4 sm:$0xff]   ;;  %v3602_v19 = vld [vmem:[%s4311_s17 + $0x2c0] ss:$16 sps:$4 sm:$0xff]  }
  0x4b   : > { %1550 = vmatprep.subr.bf16.mxu0 %v3595_v9  ;;  %1591 = vmatprep.subr.bf16.mxu1 %v3598_v14  ;;  %v3607_v20 = vld [vmem:[%s4311_s17 + $0xa4] ss:$16 sps:$4 sm:$0xff]   ;;  %v3605_v22 = vld [vmem:[%s4311_s17 + $0xa0] ss:$16 sps:$4 sm:$0xff]   ;;  %v515_v14 = vlaneseq }
  0x4c   : > { %v3610_v21 = vld [vmem:[%s4311_s17 + $0x2a4] ss:$16 sps:$4 sm:$0xff]   ;;  %v3608_v23 = vld [vmem:[%s4311_s17 + $0x2a0] ss:$16 sps:$4 sm:$0xff]  }
  0x4d   : > { %3171 = vmatmul.mubr.msk.bf16.vlgmr.msra.gmra.mxu0 %vm545_vm1, %v510_v12  ;;  %3173 = vmatmul.mubr.msk.bf16.vlgmr.msra.gmra.mxu1 %vm545_vm1, %v510_v12  ;;  %v3613_v24 = vld [vmem:[%s4311_s17 + $0x84] ss:$16 sps:$4 sm:$0xff]   ;;  %v3611_v26 = vld [vmem:[%s4311_s17 + $0x80] ss:$16 sps:$4 sm:$0xff]   ;;  %v3691_v12 = vld [vmem:[%s4311_s17 + $0xec] ss:$16 sps:$4 sm:$0xff]  }
  0x4e   : > { %1551 = vmatpush1.bf16.msra.mxu0 %v3593_v13  ;;  %1592 = vmatpush1.bf16.msra.mxu1 %v3596_v15  ;;  %v3616_v25 = vld [vmem:[%s4311_s17 + $0x284] ss:$16 sps:$4 sm:$0xff]   ;;  %v3614_v27 = vld [vmem:[%s4311_s17 + $0x280] ss:$16 sps:$4 sm:$0xff]   ;;  %v3694_v13 = vld [vmem:[%s4311_s17 + $0x2ec] ss:$16 sps:$4 sm:$0xff]  }
  0x4f   : > { %1552 = vmatprep.subr.bf16.mxu0 %v3601_v16  ;;  %1593 = vmatprep.subr.bf16.mxu1 %v3604_v17  ;;  %v3619_v28 = vld [vmem:[%s4311_s17 + $0x64] ss:$16 sps:$4 sm:$0xff]   ;;  %v3617_v30 = vld [vmem:[%s4311_s17 + $0x60] ss:$16 sps:$4 sm:$0xff]   ;;  %v4408_v15 = vshrl.u32 %v515_v14, 7 }
  0x50   : > { %v3622_v29 = vld [vmem:[%s4311_s17 + $0x264] ss:$16 sps:$4 sm:$0xff]   ;;  %v3620_v31 = vld [vmem:[%s4311_s17 + $0x260] ss:$16 sps:$4 sm:$0xff]   ;;  %v3740_v14 = vld [vmem:[%s4311_s17 + $0x3e8] ss:$16 sps:$4 sm:$0xff]  }
  0x51   : > { %v3625_v32 = vld [vmem:[%s4311_s17 + $0x44] ss:$16 sps:$4 sm:$0xff]   ;;  %v3623_v34 = vld [vmem:[%s4311_s17 + $0x40] ss:$16 sps:$4 sm:$0xff]   ;;  %v517_v16 = vsub.s32 0, %v4408_v15  ;;  %v525_v17 = vsub.s32 2, %v4408_v15 }
  0x52   : > { %1553 = vmatpush1.bf16.msra.mxu0 %v3599_v18  ;;  %1594 = vmatpush1.bf16.msra.mxu1 %v3602_v19  ;;  %v3628_v33 = vld [vmem:[%s4311_s17 + $0x244] ss:$16 sps:$4 sm:$0xff]   ;;  %v3626_v35 = vld [vmem:[%s4311_s17 + $0x240] ss:$16 sps:$4 sm:$0xff]   ;;  %v513_v18 = vld [vmem:[%s493_s23] sm:$0xf] }
  0x53   : > { %1554 = vmatprep.subr.bf16.mxu0 %v3607_v20  ;;  %1595 = vmatprep.subr.bf16.mxu1 %v3610_v21  ;;  %v3631_v36 = vld [vmem:[%s4311_s17 + $0x24] ss:$16 sps:$4 sm:$0xff]   ;;  %v3629_v38 = vld [vmem:[%s4311_s17 + $0x20] ss:$16 sps:$4 sm:$0xff]   ;;  %v521_v19 = vsub.s32 1, %v4408_v15  ;;  %v529_v20 = vsub.s32 3, %v4408_v15  ;;  %v518_v21 = vrot.slane %v513_v18, %v517_v16 }
  0x54   : > { %v3634_v37 = vld [vmem:[%s4311_s17 + $0x224] ss:$16 sps:$4 sm:$0xff]   ;;  %v3632_v39 = vld [vmem:[%s4311_s17 + $0x220] ss:$16 sps:$4 sm:$0xff]  }
  0x55   : > { %v3637_v40 = vld [vmem:[%s4311_s17 + $0x4] ss:$16 sps:$4 sm:$0xff]   ;;  %v3635_v42 = vld [vmem:[%s4311_s17] ss:$16 sps:$4 sm:$0xff]  }
  0x56   : > { %1555 = vmatpush1.bf16.msra.mxu0 %v3605_v22  ;;  %1596 = vmatpush1.bf16.msra.mxu1 %v3608_v23  ;;  %v3640_v41 = vld [vmem:[%s4311_s17 + $0x204] ss:$16 sps:$4 sm:$0xff]   ;;  %v3638_v43 = vld [vmem:[%s4311_s17 + $0x200] ss:$16 sps:$4 sm:$0xff]   ;;  %v526_v22 = vrot.slane %v513_v18, %v525_v17  ;;  %v522_v23 = vrot.slane %v513_v18, %v521_v19 }
  0x57   : > { %1556 = vmatprep.subr.bf16.mxu0 %v3613_v24  ;;  %1597 = vmatprep.subr.bf16.mxu1 %v3616_v25  ;;  %v3643_v44 = vld [vmem:[%s4311_s17 + $0x1e4] ss:$16 sps:$4 sm:$0xff]   ;;  %v3641_v46 = vld [vmem:[%s4311_s17 + $0x1e0] ss:$16 sps:$4 sm:$0xff]   ;;  %v530_v24 = vrot.slane %v513_v18, %v529_v20  ;;  %v3745_v18 = vld [vmem:[%s4311_s17 + $0x1cc] ss:$16 sps:$4 sm:$0xff]  }
  0x58   : > { %v3646_v45 = vld [vmem:[%s4311_s17 + $0x3e4] ss:$16 sps:$4 sm:$0xff]   ;;  %v3644_v47 = vld [vmem:[%s4311_s17 + $0x3e0] ss:$16 sps:$4 sm:$0xff]  }
  0x59   : > { %v3649_v48 = vld [vmem:[%s4311_s17 + $0x1c4] ss:$16 sps:$4 sm:$0xff]   ;;  %v3647_v50 = vld [vmem:[%s4311_s17 + $0x1c0] ss:$16 sps:$4 sm:$0xff]  }
  0x5a   : > { %1557 = vmatpush1.bf16.msra.mxu0 %v3611_v26  ;;  %1598 = vmatpush1.bf16.msra.mxu1 %v3614_v27  ;;  %v3652_v49 = vld [vmem:[%s4311_s17 + $0x3c4] ss:$16 sps:$4 sm:$0xff]   ;;  %v3650_v51 = vld [vmem:[%s4311_s17 + $0x3c0] ss:$16 sps:$4 sm:$0xff]  }
  0x5b   : > { %1558 = vmatprep.subr.bf16.mxu0 %v3619_v28  ;;  %1599 = vmatprep.subr.bf16.mxu1 %v3622_v29  ;;  %v3655_v52 = vld [vmem:[%s4311_s17 + $0x1a4] ss:$16 sps:$4 sm:$0xff]   ;;  %v3653_v54 = vld [vmem:[%s4311_s17 + $0x1a0] ss:$16 sps:$4 sm:$0xff]  }
  0x5c   : > { %v3658_v53 = vld [vmem:[%s4311_s17 + $0x3a4] ss:$16 sps:$4 sm:$0xff]   ;;  %v3656_v55 = vld [vmem:[%s4311_s17 + $0x3a0] ss:$16 sps:$4 sm:$0xff]  }
  0x5d   : > { %v3661_v56 = vld [vmem:[%s4311_s17 + $0x184] ss:$16 sps:$4 sm:$0xff]   ;;  %v3659_v58 = vld [vmem:[%s4311_s17 + $0x180] ss:$16 sps:$4 sm:$0xff]  }
  0x5e   : > { %1559 = vmatpush1.bf16.msra.mxu0 %v3617_v30  ;;  %1600 = vmatpush1.bf16.msra.mxu1 %v3620_v31  ;;  %v3664_v57 = vld [vmem:[%s4311_s17 + $0x384] ss:$16 sps:$4 sm:$0xff]   ;;  %v3662_v59 = vld [vmem:[%s4311_s17 + $0x380] ss:$16 sps:$4 sm:$0xff]  }
  0x5f   : > { %1560 = vmatprep.subr.bf16.mxu0 %v3625_v32  ;;  %1601 = vmatprep.subr.bf16.mxu1 %v3628_v33  ;;  %v3667_v60 = vld [vmem:[%s4311_s17 + $0x164] ss:$16 sps:$4 sm:$0xff]   ;;  %v3665_v62 = vld [vmem:[%s4311_s17 + $0x160] ss:$16 sps:$4 sm:$0xff]  }
  0x60   : > { %v3670_v61 = vld [vmem:[%s4311_s17 + $0x364] ss:$16 sps:$4 sm:$0xff]   ;;  %v3668_v63 = vld [vmem:[%s4311_s17 + $0x360] ss:$16 sps:$4 sm:$0xff]  }
  0x61   : > { %v3673_v0 = vld [vmem:[%s4311_s17 + $0x144] ss:$16 sps:$4 sm:$0xff]   ;;  %v3671_v2 = vld [vmem:[%s4311_s17 + $0x140] ss:$16 sps:$4 sm:$0xff]  }
  0x62   : > { %1561 = vmatpush1.bf16.msra.mxu0 %v3623_v34  ;;  %1602 = vmatpush1.bf16.msra.mxu1 %v3626_v35  ;;  %v3676_v1 = vld [vmem:[%s4311_s17 + $0x344] ss:$16 sps:$4 sm:$0xff]   ;;  %v3674_v3 = vld [vmem:[%s4311_s17 + $0x340] ss:$16 sps:$4 sm:$0xff]  }
  0x63   : > { %1562 = vmatprep.subr.bf16.mxu0 %v3631_v36  ;;  %1603 = vmatprep.subr.bf16.mxu1 %v3634_v37  ;;  %v3679_v4 = vld [vmem:[%s4311_s17 + $0x124] ss:$16 sps:$4 sm:$0xff]   ;;  %v3677_v6 = vld [vmem:[%s4311_s17 + $0x120] ss:$16 sps:$4 sm:$0xff]  }
  0x64   : > { %v3682_v5 = vld [vmem:[%s4311_s17 + $0x324] ss:$16 sps:$4 sm:$0xff]   ;;  %v3680_v7 = vld [vmem:[%s4311_s17 + $0x320] ss:$16 sps:$4 sm:$0xff]  }
  0x65   : > { %v3685_v8 = vld [vmem:[%s4311_s17 + $0x104] ss:$16 sps:$4 sm:$0xff]   ;;  %v3683_v10 = vld [vmem:[%s4311_s17 + $0x100] ss:$16 sps:$4 sm:$0xff]  }
  0x66   : > { %1563 = vmatpush1.bf16.msra.mxu0 %v3629_v38  ;;  %1604 = vmatpush1.bf16.msra.mxu1 %v3632_v39  ;;  %v3688_v9 = vld [vmem:[%s4311_s17 + $0x304] ss:$16 sps:$4 sm:$0xff]   ;;  %v3686_v11 = vld [vmem:[%s4311_s17 + $0x300] ss:$16 sps:$4 sm:$0xff]  }
  0x67   : > { %1564 = vmatprep.subr.bf16.mxu0 %v3637_v40  ;;  %1605 = vmatprep.subr.bf16.mxu1 %v3640_v41 }
  0x6a   : > { %1565 = vmatpush1.bf16.msra.mxu0 %v3635_v42  ;;  %1606 = vmatpush1.bf16.msra.mxu1 %v3638_v43 }
  0x6b   : > { %1566 = vmatprep.subr.bf16.mxu0 %v3643_v44  ;;  %1607 = vmatprep.subr.bf16.mxu1 %v3646_v45  ;;  %v3689_v44 = vld [vmem:[%s4311_s17 + $0xe8] ss:$16 sps:$4 sm:$0xff]  }
  0x6c   : > { %v3692_v45 = vld [vmem:[%s4311_s17 + $0x2e8] ss:$16 sps:$4 sm:$0xff]  }
  0x6e   : > { %1567 = vmatpush2.bf16.msra.mxu0 %v3641_v46  ;;  %1608 = vmatpush2.bf16.msra.mxu1 %v3644_v47  ;;  %v3697_v47 = vld [vmem:[%s4311_s17 + $0xcc] ss:$16 sps:$4 sm:$0xff]  }
  0x6f   : > { %1568 = vmatprep.subr.bf16.mxu0 %v3649_v48  ;;  %1609 = vmatprep.subr.bf16.mxu1 %v3652_v49  ;;  %v3700_v48 = vld [vmem:[%s4311_s17 + $0x2cc] ss:$16 sps:$4 sm:$0xff]   ;;  %v3695_v49 = vld [vmem:[%s4311_s17 + $0xc8] ss:$16 sps:$4 sm:$0xff]  }
  0x72   : > { %1569 = vmatpush2.bf16.msra.mxu0 %v3647_v50  ;;  %1610 = vmatpush2.bf16.msra.mxu1 %v3650_v51  ;;  %v3698_v50 = vld [vmem:[%s4311_s17 + $0x2c8] ss:$16 sps:$4 sm:$0xff]   ;;  %v3703_v51 = vld [vmem:[%s4311_s17 + $0xac] ss:$16 sps:$4 sm:$0xff]  }
  0x73   : > { %1570 = vmatprep.subr.bf16.mxu0 %v3655_v52  ;;  %1611 = vmatprep.subr.bf16.mxu1 %v3658_v53  ;;  %v3706_v52 = vld [vmem:[%s4311_s17 + $0x2ac] ss:$16 sps:$4 sm:$0xff]   ;;  %v3701_v53 = vld [vmem:[%s4311_s17 + $0xa8] ss:$16 sps:$4 sm:$0xff]  }
  0x76   : > { %1571 = vmatpush2.bf16.msra.mxu0 %v3653_v54  ;;  %1612 = vmatpush2.bf16.msra.mxu1 %v3656_v55  ;;  %v3704_v54 = vld [vmem:[%s4311_s17 + $0x2a8] ss:$16 sps:$4 sm:$0xff]   ;;  %v3709_v55 = vld [vmem:[%s4311_s17 + $0x8c] ss:$16 sps:$4 sm:$0xff]  }
  0x77   : > { %1572 = vmatprep.subr.bf16.mxu0 %v3661_v56  ;;  %1613 = vmatprep.subr.bf16.mxu1 %v3664_v57  ;;  %v3712_v56 = vld [vmem:[%s4311_s17 + $0x28c] ss:$16 sps:$4 sm:$0xff]   ;;  %v3707_v57 = vld [vmem:[%s4311_s17 + $0x88] ss:$16 sps:$4 sm:$0xff]  }
  0x7a   : > { %1573 = vmatpush2.bf16.msra.mxu0 %v3659_v58  ;;  %1614 = vmatpush2.bf16.msra.mxu1 %v3662_v59  ;;  %v3710_v58 = vld [vmem:[%s4311_s17 + $0x288] ss:$16 sps:$4 sm:$0xff]   ;;  %v3715_v59 = vld [vmem:[%s4311_s17 + $0x6c] ss:$16 sps:$4 sm:$0xff]  }
  0x7b   : > { %1574 = vmatprep.subr.bf16.mxu0 %v3667_v60  ;;  %1615 = vmatprep.subr.bf16.mxu1 %v3670_v61  ;;  %v3718_v60 = vld [vmem:[%s4311_s17 + $0x26c] ss:$16 sps:$4 sm:$0xff]   ;;  %v3713_v61 = vld [vmem:[%s4311_s17 + $0x68] ss:$16 sps:$4 sm:$0xff]  }
  0x7e   : > { %1575 = vmatpush2.bf16.msra.mxu0 %v3665_v62  ;;  %1616 = vmatpush2.bf16.msra.mxu1 %v3668_v63  ;;  %v3716_v62 = vld [vmem:[%s4311_s17 + $0x268] ss:$16 sps:$4 sm:$0xff]   ;;  %v3721_v63 = vld [vmem:[%s4311_s17 + $0x4c] ss:$16 sps:$4 sm:$0xff]  }
  0x7f   : > { %1576 = vmatprep.subr.bf16.mxu0 %v3673_v0  ;;  %1617 = vmatprep.subr.bf16.mxu1 %v3676_v1  ;;  %v3724_v0 = vld [vmem:[%s4311_s17 + $0x24c] ss:$16 sps:$4 sm:$0xff]   ;;  %v3719_v1 = vld [vmem:[%s4311_s17 + $0x48] ss:$16 sps:$4 sm:$0xff]  }
  0x82   : > { %1577 = vmatpush2.bf16.msra.mxu0 %v3671_v2  ;;  %1618 = vmatpush2.bf16.msra.mxu1 %v3674_v3  ;;  %v3722_v2 = vld [vmem:[%s4311_s17 + $0x248] ss:$16 sps:$4 sm:$0xff]   ;;  %v3727_v3 = vld [vmem:[%s4311_s17 + $0x2c] ss:$16 sps:$4 sm:$0xff]  }
  0x83   : > { %1578 = vmatprep.subr.bf16.mxu0 %v3679_v4  ;;  %1619 = vmatprep.subr.bf16.mxu1 %v3682_v5  ;;  %v3730_v4 = vld [vmem:[%s4311_s17 + $0x22c] ss:$16 sps:$4 sm:$0xff]   ;;  %v3725_v5 = vld [vmem:[%s4311_s17 + $0x28] ss:$16 sps:$4 sm:$0xff]  }
  0x86   : > { %1579 = vmatpush2.bf16.msra.mxu0 %v3677_v6  ;;  %1620 = vmatpush2.bf16.msra.mxu1 %v3680_v7  ;;  %v3728_v6 = vld [vmem:[%s4311_s17 + $0x228] ss:$16 sps:$4 sm:$0xff]   ;;  %v3733_v7 = vld [vmem:[%s4311_s17 + $0xc] ss:$16 sps:$4 sm:$0xff]  }
  0x87   : > { %1580 = vmatprep.subr.bf16.mxu0 %v3685_v8  ;;  %1621 = vmatprep.subr.bf16.mxu1 %v3688_v9  ;;  %v3736_v8 = vld [vmem:[%s4311_s17 + $0x20c] ss:$16 sps:$4 sm:$0xff]   ;;  %v3731_v9 = vld [vmem:[%s4311_s17 + $0x8] ss:$16 sps:$4 sm:$0xff]  }
  0x8a   : > { %1581 = vmatpush2.bf16.msra.mxu0 %v3683_v10  ;;  %1622 = vmatpush2.bf16.msra.mxu1 %v3686_v11  ;;  %v3734_v10 = vld [vmem:[%s4311_s17 + $0x208] ss:$16 sps:$4 sm:$0xff]   ;;  %v3739_v11 = vld [vmem:[%s4311_s17 + $0x1ec] ss:$16 sps:$4 sm:$0xff]  }
  0x8b   : > { %1632 = vmatprep.subr.bf16.mxu0 %v3691_v12  ;;  %1673 = vmatprep.subr.bf16.mxu1 %v3694_v13  ;;  %v3742_v12 = vld [vmem:[%s4311_s17 + $0x3ec] ss:$16 sps:$4 sm:$0xff]   ;;  %v3737_v13 = vld [vmem:[%s4311_s17 + $0x1e8] ss:$16 sps:$4 sm:$0xff]  }
 0x10d   : > { %v596_v25 = vpop.f32.mrf.mxu0  ;;  %v637_v26 = vpop.f32.mrf.mxu1 }
 0x10e   : > { %v597_v27 = vadd.f32 %v596_v25, %v518_v21  ;;  %v638_v28 = vadd.f32 %v637_v26, %v526_v22  ;;  %v3748_v21 = vld [vmem:[%s4311_s17 + $0x3cc] ss:$16 sps:$4 sm:$0xff]   ;;  %v3743_v22 = vld [vmem:[%s4311_s17 + $0x1c8] ss:$16 sps:$4 sm:$0xff]  }
 0x10f   : > { %v598_v29 = vpop.f32.mrf.mxu0  ;;  %v639_v30 = vpop.f32.mrf.mxu1  ;;  %v3754_v25 = vld [vmem:[%s4311_s17 + $0x3ac] ss:$16 sps:$4 sm:$0xff]   ;;  %v3749_v26 = vld [vmem:[%s4311_s17 + $0x1a8] ss:$16 sps:$4 sm:$0xff]  }
 0x110   : > { %v646_v31 = vmax.f32 %v638_v28, 0.0  ;;  %v599_v32 = vadd.f32 %v598_v29, %v522_v23  ;;  %v640_v33 = vadd.f32 %v639_v30, %v530_v24  ;;  %v644_v34 = vmax.f32 %v597_v27, 0.0  ;;  %v3746_v23 = vld [vmem:[%s4311_s17 + $0x3c8] ss:$16 sps:$4 sm:$0xff]   ;;  %v3751_v24 = vld [vmem:[%s4311_s17 + $0x1ac] ss:$16 sps:$4 sm:$0xff]  }
 0x111   : > { %v600_v35 = vpop.f32.mrf.mxu0  ;;  %v641_v36 = vpop.f32.mrf.mxu1  ;;  %v3752_v27 = vld [vmem:[%s4311_s17 + $0x3a8] ss:$16 sps:$4 sm:$0xff]   ;;  %v3757_v28 = vld [vmem:[%s4311_s17 + $0x18c] ss:$16 sps:$4 sm:$0xff]  }
 0x112   : > { %v645_v37 = vmax.f32 %v599_v32, 0.0  ;;  %v647_v38 = vmax.f32 %v640_v33, 0.0  ;;  %v4427_v39 = vpack.c.bf16 %v646_v31, %v646_v31  ;;  %v4431_v46 = vpack.c.bf16 %v644_v34, %v644_v34  ;;  %v3760_v29 = vld [vmem:[%s4311_s17 + $0x38c] ss:$16 sps:$4 sm:$0xff]   ;;  %v3755_v30 = vld [vmem:[%s4311_s17 + $0x188] ss:$16 sps:$4 sm:$0xff]  }
 0x113   : > { %v601_v40 = vpop.f32.mrf.mxu0  ;;  %v642_v41 = vpop.f32.mrf.mxu1  ;;  %v3758_v31 = vld [vmem:[%s4311_s17 + $0x388] ss:$16 sps:$4 sm:$0xff]   ;;  %v3763_v32 = vld [vmem:[%s4311_s17 + $0x16c] ss:$16 sps:$4 sm:$0xff]  }
 0x114   : > { %v779_v42 = vpack.c.bf16 %v645_v37, %v645_v37  ;;  %v781_v43 = vpack.c.bf16 %v647_v38, %v647_v38  ;;  %v3766_v33 = vld [vmem:[%s4311_s17 + $0x36c] ss:$16 sps:$4 sm:$0xff]   ;;  %v3761_v34 = vld [vmem:[%s4311_s17 + $0x168] ss:$16 sps:$4 sm:$0xff]   ;;  %v4160_v38 = vmov 1966171168  }
 0x115   : > { %v3764_v35 = vld [vmem:[%s4311_s17 + $0x368] ss:$16 sps:$4 sm:$0xff]   ;;  %v3769_v36 = vld [vmem:[%s4311_s17 + $0x14c] ss:$16 sps:$4 sm:$0xff]   ;;  %v1724_v40 = vunpack.c.l.s4 %v4160_v38 }
 0x116   : > { %1582 = vmatprep.mubr.bf16.mxu0 %v779_v42  ;;  %1623 = vmatprep.mubr.bf16.mxu1 %v781_v43  ;;  %v3772_v37 = vld [vmem:[%s4311_s17 + $0x34c] ss:$16 sps:$4 sm:$0xff]   ;;  %v3767_v41 = vld [vmem:[%s4311_s17 + $0x148] ss:$16 sps:$4 sm:$0xff]  }
 0x117   : > { %1583 = vmatmul.mubr.bf16.vlgmr.msra.gmra.mxu0 %v4431_v46  ;;  %1624 = vmatmul.mubr.bf16.vlgmr.msra.gmra.mxu1 %v4427_v39  ;;  %v3850_v38 = vld [vmem:[%s4336_s22 + $0x3a4] ss:$16 sps:$4 sm:$0xff]  }
 0x118   : > { %1633 = vmatpush1.bf16.msra.mxu0 %v3689_v44  ;;  %1674 = vmatpush1.bf16.msra.mxu1 %v3692_v45  ;;  %v3778_v44 = vld [vmem:[%s4311_s17 + $0x32c] ss:$16 sps:$4 sm:$0xff]   ;;  %v1725_v45 = vunpack.c.0.s8 %v1724_v40  ;;  %v3845_v40 = vld [vmem:[%s4336_s22 + $0x1a0] ss:$16 sps:$4 sm:$0xff]  }
 0x119   : > { %1664 = vmatprep.mubr.bf16.mxu0 %v779_v42  ;;  %1705 = vmatprep.mubr.bf16.mxu1 %v781_v43  ;;  %v3770_v42 = vld [vmem:[%s4311_s17 + $0x348] ss:$16 sps:$4 sm:$0xff]   ;;  %v3775_v43 = vld [vmem:[%s4311_s17 + $0x12c] ss:$16 sps:$4 sm:$0xff]  }
 0x11a   : > { %1634 = vmatprep.subr.bf16.mxu0 %v3697_v47  ;;  %1675 = vmatprep.subr.bf16.mxu1 %v3700_v48  ;;  %v4494_v47 = vld.sshfl [vmem:[%s482_s27] sm:$0x33 pattern:$0x75316420]  ;;  %s4163_s27 = smov (!%p3431_p2), 112  }
 0x11b   : > { %v3773_v48 = vld [vmem:[%s4311_s17 + $0x128] ss:$16 sps:$4 sm:$0xff]  }
 0x11c   : > { %1635 = vmatpush1.bf16.msra.mxu0 %v3695_v49  ;;  %1676 = vmatpush1.bf16.msra.mxu1 %v3698_v50  ;;  %v3776_v49 = vld [vmem:[%s4311_s17 + $0x328] ss:$16 sps:$4 sm:$0xff]   ;;  %v3781_v50 = vld [vmem:[%s4311_s17 + $0x10c] ss:$16 sps:$4 sm:$0xff]  }
 0x11d   : > { %1636 = vmatprep.subr.bf16.mxu0 %v3703_v51  ;;  %1677 = vmatprep.subr.bf16.mxu1 %v3706_v52  ;;  %v3784_v51 = vld [vmem:[%s4311_s17 + $0x30c] ss:$16 sps:$4 sm:$0xff]   ;;  %v1722_v52 = vcombine.high %v4494_v47, %v4494_v47 }
 0x120   : > { %1637 = vmatpush1.bf16.msra.mxu0 %v3701_v53  ;;  %1678 = vmatpush1.bf16.msra.mxu1 %v3704_v54  ;;  %v4503_v53 = vsub.s32 %v1725_v45, %v4408_v15  ;;  %v3779_v54 = vld [vmem:[%s4311_s17 + $0x108] ss:$16 sps:$4 sm:$0xff]  }
 0x121   : > { %1638 = vmatprep.subr.bf16.mxu0 %v3709_v55  ;;  %1679 = vmatprep.subr.bf16.mxu1 %v3712_v56  ;;  %v3782_v55 = vld [vmem:[%s4311_s17 + $0x308] ss:$16 sps:$4 sm:$0xff]   ;;  %v3787_v56 = vld [vmem:[%s4336_s22 + $0xe4] ss:$16 sps:$4 sm:$0xff]  }
 0x122   : > { %v3854_v45 = vld [vmem:[%s4336_s22 + $0x380] ss:$16 sps:$4 sm:$0xff]  }
 0x124   : > { %1639 = vmatpush1.bf16.msra.mxu0 %v3707_v57  ;;  %1680 = vmatpush1.bf16.msra.mxu1 %v3710_v58  ;;  %v3790_v57 = vld [vmem:[%s4336_s22 + $0x2e4] ss:$16 sps:$4 sm:$0xff]   ;;  %v4510_v58 = vrot.slane %v1722_v52, %v4503_v53 }
 0x125   : > { %1640 = vmatprep.subr.bf16.mxu0 %v3715_v59  ;;  %1681 = vmatprep.subr.bf16.mxu1 %v3718_v60  ;;  %v3785_v59 = vld [vmem:[%s4336_s22 + $0xe0] ss:$16 sps:$4 sm:$0xff]   ;;  %v3865_v52 = vld [vmem:[%s4336_s22 + $0x144] ss:$16 sps:$4 sm:$0xff]  }
 0x126   : > { %v3788_v60 = vld [vmem:[%s4336_s22 + $0x2e0] ss:$16 sps:$4 sm:$0xff]  }
 0x128   : > { %1641 = vmatpush1.bf16.msra.mxu0 %v3713_v61  ;;  %1682 = vmatpush1.bf16.msra.mxu1 %v3716_v62  ;;  %v3793_v61 = vld [vmem:[%s4336_s22 + $0xc4] ss:$16 sps:$4 sm:$0xff]  }
 0x129   : > { %1642 = vmatprep.subr.bf16.mxu0 %v3721_v63  ;;  %1683 = vmatprep.subr.bf16.mxu1 %v3724_v0  ;;  %v3796_v62 = vld [vmem:[%s4336_s22 + $0x2c4] ss:$16 sps:$4 sm:$0xff]   ;;  %v4518_v63 = vcombine.high %v4510_v58, %v4510_v58  ;;  %v3791_v0 = vld [vmem:[%s4336_s22 + $0xc0] ss:$16 sps:$4 sm:$0xff]  }
 0x12c   : > { %1643 = vmatpush1.bf16.msra.mxu0 %v3719_v1  ;;  %1684 = vmatpush1.bf16.msra.mxu1 %v3722_v2  ;;  %v3794_v1 = vld [vmem:[%s4336_s22 + $0x2c0] ss:$16 sps:$4 sm:$0xff]   ;;  %v3799_v2 = vld [vmem:[%s4336_s22 + $0xa4] ss:$16 sps:$4 sm:$0xff]  }
 0x12d   : > { %1644 = vmatprep.subr.bf16.mxu0 %v3727_v3  ;;  %1685 = vmatprep.subr.bf16.mxu1 %v3730_v4  ;;  %v3802_v3 = vld [vmem:[%s4336_s22 + $0x2a4] ss:$16 sps:$4 sm:$0xff]  }
 0x12e   : > { %v3805_v4 = vld [vmem:[%s4336_s22 + $0x84] ss:$16 sps:$4 sm:$0xff]  }
 0x130   : > { %1645 = vmatpush1.bf16.msra.mxu0 %v3725_v5  ;;  %1686 = vmatpush1.bf16.msra.mxu1 %v3728_v6  ;;  %v3808_v5 = vld [vmem:[%s4336_s22 + $0x284] ss:$16 sps:$4 sm:$0xff]   ;;  %v3803_v6 = vld [vmem:[%s4336_s22 + $0x80] ss:$16 sps:$4 sm:$0xff]  }
 0x131   : > { %1646 = vmatprep.subr.bf16.mxu0 %v3733_v7  ;;  %1687 = vmatprep.subr.bf16.mxu1 %v3736_v8  ;;  %v3806_v7 = vld [vmem:[%s4336_s22 + $0x280] ss:$16 sps:$4 sm:$0xff]   ;;  %v3811_v8 = vld [vmem:[%s4336_s22 + $0x64] ss:$16 sps:$4 sm:$0xff]  }
 0x134   : > { %1647 = vmatpush1.bf16.msra.mxu0 %v3731_v9  ;;  %1688 = vmatpush1.bf16.msra.mxu1 %v3734_v10  ;;  %v3814_v9 = vld [vmem:[%s4336_s22 + $0x264] ss:$16 sps:$4 sm:$0xff]   ;;  %v3809_v10 = vld [vmem:[%s4336_s22 + $0x60] ss:$16 sps:$4 sm:$0xff]  }
 0x135   : > { %1648 = vmatprep.subr.bf16.mxu0 %v3739_v11  ;;  %1689 = vmatprep.subr.bf16.mxu1 %v3742_v12  ;;  %v3812_v11 = vld [vmem:[%s4336_s22 + $0x260] ss:$16 sps:$4 sm:$0xff]   ;;  %v3817_v12 = vld [vmem:[%s4336_s22 + $0x44] ss:$16 sps:$4 sm:$0xff]  }
 0x138   : > { %1649 = vmatpush2.bf16.msra.mxu0 %v3737_v13  ;;  %1690 = vmatpush2.bf16.msra.mxu1 %v3740_v14  ;;  %v3820_v13 = vld [vmem:[%s4336_s22 + $0x244] ss:$16 sps:$4 sm:$0xff]   ;;  %v3815_v14 = vld [vmem:[%s4336_s22 + $0x40] ss:$16 sps:$4 sm:$0xff]  }
 0x139   : > { %1650 = vmatprep.subr.bf16.mxu0 %v3745_v18  ;;  %1691 = vmatprep.subr.bf16.mxu1 %v3748_v21  ;;  %v3818_v18 = vld [vmem:[%s4336_s22 + $0x240] ss:$16 sps:$4 sm:$0xff]   ;;  %v3823_v21 = vld [vmem:[%s4336_s22 + $0x24] ss:$16 sps:$4 sm:$0xff]  }
 0x13c   : > { %1651 = vmatpush2.bf16.msra.mxu0 %v3743_v22  ;;  %1692 = vmatpush2.bf16.msra.mxu1 %v3746_v23  ;;  %v3826_v22 = vld [vmem:[%s4336_s22 + $0x224] ss:$16 sps:$4 sm:$0xff]   ;;  %v3821_v23 = vld [vmem:[%s4336_s22 + $0x20] ss:$16 sps:$4 sm:$0xff]  }
 0x13d   : > { %1652 = vmatprep.subr.bf16.mxu0 %v3751_v24  ;;  %1693 = vmatprep.subr.bf16.mxu1 %v3754_v25  ;;  %v3824_v24 = vld [vmem:[%s4336_s22 + $0x220] ss:$16 sps:$4 sm:$0xff]   ;;  %v3829_v25 = vld [vmem:[%s4336_s22 + $0x4] ss:$16 sps:$4 sm:$0xff]  }
 0x140   : > { %1653 = vmatpush2.bf16.msra.mxu0 %v3749_v26  ;;  %1694 = vmatpush2.bf16.msra.mxu1 %v3752_v27  ;;  %v3832_v26 = vld [vmem:[%s4336_s22 + $0x204] ss:$16 sps:$4 sm:$0xff]   ;;  %v3827_v27 = vld [vmem:[%s4336_s22] ss:$16 sps:$4 sm:$0xff]  }
 0x141   : > { %1654 = vmatprep.subr.bf16.mxu0 %v3757_v28  ;;  %1695 = vmatprep.subr.bf16.mxu1 %v3760_v29  ;;  %v3830_v28 = vld [vmem:[%s4336_s22 + $0x200] ss:$16 sps:$4 sm:$0xff]   ;;  %v3835_v29 = vld [vmem:[%s4336_s22 + $0x1e4] ss:$16 sps:$4 sm:$0xff]  }
 0x144   : > { %1655 = vmatpush2.bf16.msra.mxu0 %v3755_v30  ;;  %1696 = vmatpush2.bf16.msra.mxu1 %v3758_v31  ;;  %v3838_v30 = vld [vmem:[%s4336_s22 + $0x3e4] ss:$16 sps:$4 sm:$0xff]   ;;  %v3833_v31 = vld [vmem:[%s4336_s22 + $0x1e0] ss:$16 sps:$4 sm:$0xff]  }
 0x145   : > { %1656 = vmatprep.subr.bf16.mxu0 %v3763_v32  ;;  %1697 = vmatprep.subr.bf16.mxu1 %v3766_v33  ;;  %v3836_v32 = vld [vmem:[%s4336_s22 + $0x3e0] ss:$16 sps:$4 sm:$0xff]   ;;  %v3841_v33 = vld [vmem:[%s4336_s22 + $0x1c4] ss:$16 sps:$4 sm:$0xff]  }
 0x148   : > { %1657 = vmatpush2.bf16.msra.mxu0 %v3761_v34  ;;  %1698 = vmatpush2.bf16.msra.mxu1 %v3764_v35  ;;  %v3844_v34 = vld [vmem:[%s4336_s22 + $0x3c4] ss:$16 sps:$4 sm:$0xff]   ;;  %v3839_v35 = vld [vmem:[%s4336_s22 + $0x1c0] ss:$16 sps:$4 sm:$0xff]  }
 0x149   : > { %1658 = vmatprep.subr.bf16.mxu0 %v3769_v36  ;;  %1699 = vmatprep.subr.bf16.mxu1 %v3772_v37  ;;  %v3842_v36 = vld [vmem:[%s4336_s22 + $0x3c0] ss:$16 sps:$4 sm:$0xff]   ;;  %v3847_v37 = vld [vmem:[%s4336_s22 + $0x1a4] ss:$16 sps:$4 sm:$0xff]  }
 0x14c   : > { %1659 = vmatpush2.bf16.msra.mxu0 %v3767_v41  ;;  %1700 = vmatpush2.bf16.msra.mxu1 %v3770_v42  ;;  %v3848_v41 = vld [vmem:[%s4336_s22 + $0x3a0] ss:$16 sps:$4 sm:$0xff]   ;;  %v3853_v42 = vld [vmem:[%s4336_s22 + $0x184] ss:$16 sps:$4 sm:$0xff]  }
 0x14d   : > { %1660 = vmatprep.subr.bf16.mxu0 %v3775_v43  ;;  %1701 = vmatprep.subr.bf16.mxu1 %v3778_v44  ;;  %v3856_v43 = vld [vmem:[%s4336_s22 + $0x384] ss:$16 sps:$4 sm:$0xff]   ;;  %v3851_v44 = vld [vmem:[%s4336_s22 + $0x180] ss:$16 sps:$4 sm:$0xff]  }
 0x150   : > { %1661 = vmatpush2.bf16.msra.mxu0 %v3773_v48  ;;  %1702 = vmatpush2.bf16.msra.mxu1 %v3776_v49  ;;  %v3859_v48 = vld [vmem:[%s4336_s22 + $0x164] ss:$16 sps:$4 sm:$0xff]  }
 0x151   : > { %1662 = vmatprep.subr.bf16.mxu0 %v3781_v50  ;;  %1703 = vmatprep.subr.bf16.mxu1 %v3784_v51  ;;  %v3862_v49 = vld [vmem:[%s4336_s22 + $0x364] ss:$16 sps:$4 sm:$0xff]   ;;  %v3857_v50 = vld [vmem:[%s4336_s22 + $0x160] ss:$16 sps:$4 sm:$0xff]  }
 0x152   : > { %v3860_v51 = vld [vmem:[%s4336_s22 + $0x360] ss:$16 sps:$4 sm:$0xff]  }
 0x154   : > { %1663 = vmatpush2.bf16.msra.mxu0 %v3779_v54  ;;  %1704 = vmatpush2.bf16.msra.mxu1 %v3782_v55  ;;  %v3868_v54 = vld [vmem:[%s4336_s22 + $0x344] ss:$16 sps:$4 sm:$0xff]   ;;  %v3863_v55 = vld [vmem:[%s4336_s22 + $0x140] ss:$16 sps:$4 sm:$0xff]  }
 0x155   : > { %2383 = vmatprep.subr.bf16.mxu0 %v3787_v56  ;;  %2424 = vmatprep.subr.bf16.mxu1 %v3790_v57  ;;  %v3866_v56 = vld [vmem:[%s4336_s22 + $0x340] ss:$16 sps:$4 sm:$0xff]   ;;  %v3871_v57 = vld [vmem:[%s4336_s22 + $0x124] ss:$16 sps:$4 sm:$0xff]  }
 0x157   : > { %1665 = vmatmul.mubr.bf16.vlgmr.msra.gmra.mxu0 %v4431_v46  ;;  %1706 = vmatmul.mubr.bf16.vlgmr.msra.gmra.mxu1 %v4427_v39  ;;  %v3797_v39 = vld [vmem:[%s4336_s22 + $0xa0] ss:$16 sps:$4 sm:$0xff]  }
 0x158   : > { %2384 = vmatpush1.bf16.msra.mxu0 %v3785_v59  ;;  %2425 = vmatpush1.bf16.msra.mxu1 %v3788_v60  ;;  %v3800_v46 = vld [vmem:[%s4336_s22 + $0x2a0] ss:$16 sps:$4 sm:$0xff]   ;;  %v3874_v59 = vld [vmem:[%s4336_s22 + $0x324] ss:$16 sps:$4 sm:$0xff]  }
 0x159   : > { %2385 = vmatprep.subr.bf16.mxu0 %v3793_v61  ;;  %2426 = vmatprep.subr.bf16.mxu1 %v3796_v62  ;;  %v3869_v60 = vld [vmem:[%s4336_s22 + $0x120] ss:$16 sps:$4 sm:$0xff]   ;;  %v3877_v62 = vld [vmem:[%s4336_s22 + $0x104] ss:$16 sps:$4 sm:$0xff]  }
 0x15a   : > { %2415 = vmatprep.mubr.bf16.mxu0 %v4510_v58  ;;  %2456 = vmatprep.mubr.bf16.mxu1 %v4518_v63  ;;  %v3872_v61 = vld [vmem:[%s4336_s22 + $0x320] ss:$16 sps:$4 sm:$0xff]  }
 0x15c   : > { %2386 = vmatpush1.bf16.msra.mxu0 %v3791_v0  ;;  %2427 = vmatpush1.bf16.msra.mxu1 %v3794_v1  ;;  %v3880_v0 = vld [vmem:[%s4336_s22 + $0x304] ss:$16 sps:$4 sm:$0xff]   ;;  %v4582_v1 = vrot.slane %v4494_v47, %v4503_v53  ;;  %v3881_v47 = vld [vmem:[%s4336_s22 + $0xe8] ss:$16 sps:$4 sm:$0xff]  }
 0x15d   : > { %2387 = vmatprep.subr.bf16.mxu0 %v3799_v2  ;;  %2428 = vmatprep.subr.bf16.mxu1 %v3802_v3  ;;  %v3875_v2 = vld [vmem:[%s4336_s22 + $0x100] ss:$16 sps:$4 sm:$0xff]   ;;  %v3884_v53 = vld [vmem:[%s4336_s22 + $0x2e8] ss:$16 sps:$4 sm:$0xff]  }
 0x15e   : > { %v3878_v3 = vld [vmem:[%s4336_s22 + $0x300] ss:$16 sps:$4 sm:$0xff]  }
 0x160   : > { %2388 = vmatpush1.bf16.msra.mxu0 %v3797_v39  ;;  %2429 = vmatpush1.bf16.msra.mxu1 %v3800_v46  ;;  %v3883_v39 = vld [vmem:[%s4336_s22 + $0xec] ss:$16 sps:$4 sm:$0xff]  }
 0x161   : > { %2389 = vmatprep.subr.bf16.mxu0 %v3805_v4  ;;  %2430 = vmatprep.subr.bf16.mxu1 %v3808_v5  ;;  %v3886_v46 = vld [vmem:[%s4336_s22 + $0x2ec] ss:$16 sps:$4 sm:$0xff]   ;;  %v4590_v4 = vcombine.high %v4582_v1, %v4582_v1 }
 0x162   : > { %v3889_v5 = vld [vmem:[%s4336_s22 + $0xcc] ss:$16 sps:$4 sm:$0xff]  }
 0x164   : > { %2390 = vmatpush1.bf16.msra.mxu0 %v3803_v6  ;;  %2431 = vmatpush1.bf16.msra.mxu1 %v3806_v7  ;;  %v3892_v6 = vld [vmem:[%s4336_s22 + $0x2cc] ss:$16 sps:$4 sm:$0xff]   ;;  %v3887_v7 = vld [vmem:[%s4336_s22 + $0xc8] ss:$16 sps:$4 sm:$0xff]  }
 0x165   : > { %2391 = vmatprep.subr.bf16.mxu0 %v3811_v8  ;;  %2432 = vmatprep.subr.bf16.mxu1 %v3814_v9  ;;  %v3890_v8 = vld [vmem:[%s4336_s22 + $0x2c8] ss:$16 sps:$4 sm:$0xff]   ;;  %v3895_v9 = vld [vmem:[%s4336_s22 + $0xac] ss:$16 sps:$4 sm:$0xff]  }
 0x168   : > { %2392 = vmatpush1.bf16.msra.mxu0 %v3809_v10  ;;  %2433 = vmatpush1.bf16.msra.mxu1 %v3812_v11  ;;  %v3898_v10 = vld [vmem:[%s4336_s22 + $0x2ac] ss:$16 sps:$4 sm:$0xff]   ;;  %v3893_v11 = vld [vmem:[%s4336_s22 + $0xa8] ss:$16 sps:$4 sm:$0xff]  }
 0x169   : > { %2393 = vmatprep.subr.bf16.mxu0 %v3817_v12  ;;  %2434 = vmatprep.subr.bf16.mxu1 %v3820_v13  ;;  %v3896_v12 = vld [vmem:[%s4336_s22 + $0x2a8] ss:$16 sps:$4 sm:$0xff]   ;;  %v3901_v13 = vld [vmem:[%s4336_s22 + $0x8c] ss:$16 sps:$4 sm:$0xff]  }
 0x16c   : > { %2394 = vmatpush1.bf16.msra.mxu0 %v3815_v14  ;;  %2435 = vmatpush1.bf16.msra.mxu1 %v3818_v18  ;;  %v3904_v14 = vld [vmem:[%s4336_s22 + $0x28c] ss:$16 sps:$4 sm:$0xff]   ;;  %v3899_v18 = vld [vmem:[%s4336_s22 + $0x88] ss:$16 sps:$4 sm:$0xff]  }
 0x16d   : > { %2395 = vmatprep.subr.bf16.mxu0 %v3823_v21  ;;  %2436 = vmatprep.subr.bf16.mxu1 %v3826_v22  ;;  %v3910_v21 = vld [vmem:[%s4336_s22 + $0x26c] ss:$16 sps:$4 sm:$0xff]   ;;  %v3905_v22 = vld [vmem:[%s4336_s22 + $0x68] ss:$16 sps:$4 sm:$0xff]  }
 0x170   : > { %2396 = vmatpush1.bf16.msra.mxu0 %v3821_v23  ;;  %2437 = vmatpush1.bf16.msra.mxu1 %v3824_v24  ;;  %v3908_v23 = vld [vmem:[%s4336_s22 + $0x268] ss:$16 sps:$4 sm:$0xff]   ;;  %v3913_v24 = vld [vmem:[%s4336_s22 + $0x4c] ss:$16 sps:$4 sm:$0xff]  }
 0x171   : > { %2397 = vmatprep.subr.bf16.mxu0 %v3829_v25  ;;  %2438 = vmatprep.subr.bf16.mxu1 %v3832_v26  ;;  %v3916_v25 = vld [vmem:[%s4336_s22 + $0x24c] ss:$16 sps:$4 sm:$0xff]   ;;  %v3911_v26 = vld [vmem:[%s4336_s22 + $0x48] ss:$16 sps:$4 sm:$0xff]  }
 0x174   : > { %2398 = vmatpush1.bf16.msra.mxu0 %v3827_v27  ;;  %2439 = vmatpush1.bf16.msra.mxu1 %v3830_v28  ;;  %v3914_v27 = vld [vmem:[%s4336_s22 + $0x248] ss:$16 sps:$4 sm:$0xff]   ;;  %v3919_v28 = vld [vmem:[%s4336_s22 + $0x2c] ss:$16 sps:$4 sm:$0xff]  }
 0x175   : > { %2399 = vmatprep.subr.bf16.mxu0 %v3835_v29  ;;  %2440 = vmatprep.subr.bf16.mxu1 %v3838_v30  ;;  %v3922_v29 = vld [vmem:[%s4336_s22 + $0x22c] ss:$16 sps:$4 sm:$0xff]   ;;  %v3917_v30 = vld [vmem:[%s4336_s22 + $0x28] ss:$16 sps:$4 sm:$0xff]  }
 0x178   : > { %2400 = vmatpush2.bf16.msra.mxu0 %v3833_v31  ;;  %2441 = vmatpush2.bf16.msra.mxu1 %v3836_v32  ;;  %v3920_v31 = vld [vmem:[%s4336_s22 + $0x228] ss:$16 sps:$4 sm:$0xff]   ;;  %v3925_v32 = vld [vmem:[%s4336_s22 + $0xc] ss:$16 sps:$4 sm:$0xff]  }
 0x179   : > { %2401 = vmatprep.subr.bf16.mxu0 %v3841_v33  ;;  %2442 = vmatprep.subr.bf16.mxu1 %v3844_v34  ;;  %v3928_v33 = vld [vmem:[%s4336_s22 + $0x20c] ss:$16 sps:$4 sm:$0xff]   ;;  %v3923_v34 = vld [vmem:[%s4336_s22 + $0x8] ss:$16 sps:$4 sm:$0xff]  }
 0x17c   : > { %2402 = vmatpush2.bf16.msra.mxu0 %v3839_v35  ;;  %2443 = vmatpush2.bf16.msra.mxu1 %v3842_v36  ;;  %v3926_v35 = vld [vmem:[%s4336_s22 + $0x208] ss:$16 sps:$4 sm:$0xff]   ;;  %v3931_v36 = vld [vmem:[%s4336_s22 + $0x1ec] ss:$16 sps:$4 sm:$0xff]  }
 0x17d   : > { %2403 = vmatprep.subr.bf16.mxu0 %v3847_v37  ;;  %2444 = vmatprep.subr.bf16.mxu1 %v3850_v38  ;;  %v3934_v37 = vld [vmem:[%s4336_s22 + $0x3ec] ss:$16 sps:$4 sm:$0xff]   ;;  %v3929_v38 = vld [vmem:[%s4336_s22 + $0x1e8] ss:$16 sps:$4 sm:$0xff]  }
 0x180   : > { %2404 = vmatpush2.bf16.msra.mxu0 %v3845_v40  ;;  %2445 = vmatpush2.bf16.msra.mxu1 %v3848_v41  ;;  %v3932_v40 = vld [vmem:[%s4336_s22 + $0x3e8] ss:$16 sps:$4 sm:$0xff]   ;;  %v3937_v41 = vld [vmem:[%s4336_s22 + $0x1cc] ss:$16 sps:$4 sm:$0xff]  }
 0x181   : > { %2405 = vmatprep.subr.bf16.mxu0 %v3853_v42  ;;  %2446 = vmatprep.subr.bf16.mxu1 %v3856_v43  ;;  %v3940_v42 = vld [vmem:[%s4336_s22 + $0x3cc] ss:$16 sps:$4 sm:$0xff]   ;;  %v3935_v43 = vld [vmem:[%s4336_s22 + $0x1c8] ss:$16 sps:$4 sm:$0xff]  }
 0x184   : > { %2406 = vmatpush2.bf16.msra.mxu0 %v3851_v44  ;;  %2447 = vmatpush2.bf16.msra.mxu1 %v3854_v45  ;;  %v3938_v44 = vld [vmem:[%s4336_s22 + $0x3c8] ss:$16 sps:$4 sm:$0xff]   ;;  %v3943_v45 = vld [vmem:[%s4336_s22 + $0x1ac] ss:$16 sps:$4 sm:$0xff]  }
 0x185   : > { %2407 = vmatprep.subr.bf16.mxu0 %v3859_v48  ;;  %2448 = vmatprep.subr.bf16.mxu1 %v3862_v49  ;;  %v3946_v48 = vld [vmem:[%s4336_s22 + $0x3ac] ss:$16 sps:$4 sm:$0xff]   ;;  %v3941_v49 = vld [vmem:[%s4336_s22 + $0x1a8] ss:$16 sps:$4 sm:$0xff]  }
 0x188   : > { %2408 = vmatpush2.bf16.msra.mxu0 %v3857_v50  ;;  %2449 = vmatpush2.bf16.msra.mxu1 %v3860_v51  ;;  %v3944_v50 = vld [vmem:[%s4336_s22 + $0x3a8] ss:$16 sps:$4 sm:$0xff]   ;;  %v3949_v51 = vld [vmem:[%s4336_s22 + $0x18c] ss:$16 sps:$4 sm:$0xff]  }
 0x189   : > { %2409 = vmatprep.subr.bf16.mxu0 %v3865_v52  ;;  %2450 = vmatprep.subr.bf16.mxu1 %v3868_v54  ;;  %v3952_v52 = vld [vmem:[%s4336_s22 + $0x38c] ss:$16 sps:$4 sm:$0xff]   ;;  %v3947_v54 = vld [vmem:[%s4336_s22 + $0x188] ss:$16 sps:$4 sm:$0xff]  }
 0x18c   : > { %2410 = vmatpush2.bf16.msra.mxu0 %v3863_v55  ;;  %2451 = vmatpush2.bf16.msra.mxu1 %v3866_v56  ;;  %v3950_v55 = vld [vmem:[%s4336_s22 + $0x388] ss:$16 sps:$4 sm:$0xff]   ;;  %v3955_v56 = vld [vmem:[%s4336_s22 + $0x16c] ss:$16 sps:$4 sm:$0xff]  }
 0x18d   : > { %2411 = vmatprep.subr.bf16.mxu0 %v3871_v57  ;;  %2452 = vmatprep.subr.bf16.mxu1 %v3874_v59  ;;  %v3958_v57 = vld [vmem:[%s4336_s22 + $0x36c] ss:$16 sps:$4 sm:$0xff]   ;;  %v3953_v59 = vld [vmem:[%s4336_s22 + $0x168] ss:$16 sps:$4 sm:$0xff]  }
 0x190   : > { %2412 = vmatpush2.bf16.msra.mxu0 %v3869_v60  ;;  %2453 = vmatpush2.bf16.msra.mxu1 %v3872_v61  ;;  %v3956_v60 = vld [vmem:[%s4336_s22 + $0x368] ss:$16 sps:$4 sm:$0xff]   ;;  %v3961_v61 = vld [vmem:[%s4336_s22 + $0x14c] ss:$16 sps:$4 sm:$0xff]  }
 0x191   : > { %2413 = vmatprep.subr.bf16.mxu0 %v3877_v62  ;;  %2454 = vmatprep.subr.bf16.mxu1 %v3880_v0  ;;  %v3964_v62 = vld [vmem:[%s4336_s22 + $0x34c] ss:$16 sps:$4 sm:$0xff]   ;;  %v3959_v0 = vld [vmem:[%s4336_s22 + $0x148] ss:$16 sps:$4 sm:$0xff]  }
 0x194   : > { %2414 = vmatpush2.bf16.msra.mxu0 %v3875_v2  ;;  %2455 = vmatpush2.bf16.msra.mxu1 %v3878_v3  ;;  %v3962_v2 = vld [vmem:[%s4336_s22 + $0x348] ss:$16 sps:$4 sm:$0xff]   ;;  %v3967_v3 = vld [vmem:[%s4336_s22 + $0x12c] ss:$16 sps:$4 sm:$0xff]  }
 0x195   : > { %2465 = vmatprep.subr.bf16.mxu0 %v3883_v39  ;;  %2506 = vmatprep.subr.bf16.mxu1 %v3886_v46  ;;  %v3970_v39 = vld [vmem:[%s4336_s22 + $0x32c] ss:$16 sps:$4 sm:$0xff]   ;;  %v3965_v46 = vld [vmem:[%s4336_s22 + $0x128] ss:$16 sps:$4 sm:$0xff]  }
 0x197   : > { %2416 = vmatmul.mubr.bf16.vlgmr.msra.gmra.mxu0 %v4582_v1  ;;  %2457 = vmatmul.mubr.bf16.vlgmr.msra.gmra.mxu1 %v4590_v4 }
 0x198   : > { %2466 = vmatpush1.bf16.msra.mxu0 %v3881_v47  ;;  %2507 = vmatpush1.bf16.msra.mxu1 %v3884_v53  ;;  %v3968_v47 = vld [vmem:[%s4336_s22 + $0x328] ss:$16 sps:$4 sm:$0xff]   ;;  %v3973_v53 = vld [vmem:[%s4336_s22 + $0x10c] ss:$16 sps:$4 sm:$0xff]  }
 0x199   : > { %2467 = vmatprep.subr.bf16.mxu0 %v3889_v5  ;;  %2508 = vmatprep.subr.bf16.mxu1 %v3892_v6  ;;  %v3976_v5 = vld [vmem:[%s4336_s22 + $0x30c] ss:$16 sps:$4 sm:$0xff]   ;;  %v3971_v6 = vld [vmem:[%s4336_s22 + $0x108] ss:$16 sps:$4 sm:$0xff]  }
 0x19a   : > { %2497 = vmatprep.mubr.bf16.mxu0 %v4510_v58  ;;  %2538 = vmatprep.mubr.bf16.mxu1 %v4518_v63  ;;  %v3902_v58 = vld [vmem:[%s4336_s22 + $0x288] ss:$16 sps:$4 sm:$0xff]   ;;  %v3907_v63 = vld [vmem:[%s4336_s22 + $0x6c] ss:$16 sps:$4 sm:$0xff]  }
 0x19c   : > { %2468 = vmatpush1.bf16.msra.mxu0 %v3887_v7  ;;  %2509 = vmatpush1.bf16.msra.mxu1 %v3890_v8  ;;  %v3974_v7 = vld [vmem:[%s4336_s22 + $0x308] ss:$16 sps:$4 sm:$0xff]   ;;  %s4162_s22 = smov (!%p3431_p2), 16  }
 0x19d   : > { %2469 = vmatprep.subr.bf16.mxu0 %v3895_v9  ;;  %2510 = vmatprep.subr.bf16.mxu1 %v3898_v10 }
 0x1a0   : > { %2470 = vmatpush1.bf16.msra.mxu0 %v3893_v11  ;;  %2511 = vmatpush1.bf16.msra.mxu1 %v3896_v12 }
 0x1a1   : > { %2471 = vmatprep.subr.bf16.mxu0 %v3901_v13  ;;  %2512 = vmatprep.subr.bf16.mxu1 %v3904_v14 }
 0x1a4   : > { %2472 = vmatpush1.bf16.msra.mxu0 %v3899_v18  ;;  %2513 = vmatpush1.bf16.msra.mxu1 %v3902_v58 }
 0x1a5   : > { %2473 = vmatprep.subr.bf16.mxu0 %v3907_v63  ;;  %2514 = vmatprep.subr.bf16.mxu1 %v3910_v21 }
 0x1a8   : > { %2474 = vmatpush1.bf16.msra.mxu0 %v3905_v22  ;;  %2515 = vmatpush1.bf16.msra.mxu1 %v3908_v23 }
 0x1a9   : > { %2475 = vmatprep.subr.bf16.mxu0 %v3913_v24  ;;  %2516 = vmatprep.subr.bf16.mxu1 %v3916_v25 }
 0x1ac   : > { %2476 = vmatpush1.bf16.msra.mxu0 %v3911_v26  ;;  %2517 = vmatpush1.bf16.msra.mxu1 %v3914_v27 }
 0x1ad   : > { %2477 = vmatprep.subr.bf16.mxu0 %v3919_v28  ;;  %2518 = vmatprep.subr.bf16.mxu1 %v3922_v29 }
 0x1b0   : > { %2478 = vmatpush1.bf16.msra.mxu0 %v3917_v30  ;;  %2519 = vmatpush1.bf16.msra.mxu1 %v3920_v31 }
 0x1b1   : > { %2479 = vmatprep.subr.bf16.mxu0 %v3925_v32  ;;  %2520 = vmatprep.subr.bf16.mxu1 %v3928_v33 }
 0x1b4   : > { %2480 = vmatpush1.bf16.msra.mxu0 %v3923_v34  ;;  %2521 = vmatpush1.bf16.msra.mxu1 %v3926_v35 }
 0x1b5   : > { %2481 = vmatprep.subr.bf16.mxu0 %v3931_v36  ;;  %2522 = vmatprep.subr.bf16.mxu1 %v3934_v37 }
 0x1b8   : > { %2482 = vmatpush2.bf16.msra.mxu0 %v3929_v38  ;;  %2523 = vmatpush2.bf16.msra.mxu1 %v3932_v40 }
 0x1b9   : > { %2483 = vmatprep.subr.bf16.mxu0 %v3937_v41  ;;  %2524 = vmatprep.subr.bf16.mxu1 %v3940_v42 }
 0x1bc   : > { %2484 = vmatpush2.bf16.msra.mxu0 %v3935_v43  ;;  %2525 = vmatpush2.bf16.msra.mxu1 %v3938_v44  ;;  %v4161_v43 = vmov 1983009808  }
 0x1bd   : > { %2485 = vmatprep.subr.bf16.mxu0 %v3943_v45  ;;  %2526 = vmatprep.subr.bf16.mxu1 %v3946_v48  ;;  %v2554_v44 = vunpack.c.l.s4 %v4161_v43 }
 0x1c0   : > { %2486 = vmatpush2.bf16.msra.mxu0 %v3941_v49  ;;  %2527 = vmatpush2.bf16.msra.mxu1 %v3944_v50  ;;  %v2555_v49 = vunpack.c.0.s8 %v2554_v44 }
 0x1c1   : > { %2487 = vmatprep.subr.bf16.mxu0 %v3949_v51  ;;  %2528 = vmatprep.subr.bf16.mxu1 %v3952_v52 }
 0x1c4   : > { %2488 = vmatpush2.bf16.msra.mxu0 %v3947_v54  ;;  %2529 = vmatpush2.bf16.msra.mxu1 %v3950_v55 }
 0x1c5   : > { %2489 = vmatprep.subr.bf16.mxu0 %v3955_v56  ;;  %2530 = vmatprep.subr.bf16.mxu1 %v3958_v57  ;;  %v4661_v57 = vsub.s32 %v2555_v49, %v4408_v15 }
 0x1c8   : > { %2490 = vmatpush2.bf16.msra.mxu0 %v3953_v59  ;;  %2531 = vmatpush2.bf16.msra.mxu1 %v3956_v60 }
 0x1c9   : > { %2491 = vmatprep.subr.bf16.mxu0 %v3961_v61  ;;  %2532 = vmatprep.subr.bf16.mxu1 %v3964_v62 }
 0x1cc   : > { %2492 = vmatpush2.bf16.msra.mxu0 %v3959_v0  ;;  %2533 = vmatpush2.bf16.msra.mxu1 %v3962_v2 }
 0x1cd   : > { %2493 = vmatprep.subr.bf16.mxu0 %v3967_v3  ;;  %2534 = vmatprep.subr.bf16.mxu1 %v3970_v39  ;;  %v648_v39 = vld [vmem:[#allocation2] sm:$0xff] }
 0x1d0   : > { %2494 = vmatpush2.bf16.msra.mxu0 %v3965_v46  ;;  %2535 = vmatpush2.bf16.msra.mxu1 %v3968_v47 }
 0x1d1   : > { %2495 = vmatprep.subr.bf16.mxu0 %v3973_v53  ;;  %2536 = vmatprep.subr.bf16.mxu1 %v3976_v5 }
 0x1d4   : > { %2496 = vmatpush2.bf16.msra.mxu0 %v3971_v6  ;;  %2537 = vmatpush2.bf16.msra.mxu1 %v3974_v7 }
 0x1d7   : > { %2498 = vmatmul.mubr.bf16.vlgmr.msra.gmra.mxu0 %v4582_v1  ;;  %2539 = vmatmul.mubr.bf16.vlgmr.msra.gmra.mxu1 %v4590_v4  ;;  %v1584_v8 = vpop.f32.mrf.mxu0  ;;  %v1625_v9 = vpop.f32.mrf.mxu1 }
 0x1d8   : > { %v1626_v10 = vadd.f32 %v1625_v9, %v1584_v8 }
 0x1d9   : > { %v1586_v11 = vpop.f32.mrf.mxu0  ;;  %v1627_v12 = vpop.f32.mrf.mxu1 }
 0x1da   : > { %v1628_v13 = vadd.f32 %v1627_v12, %v1586_v11 }
 0x1db   : > { %v1588_v14 = vpop.f32.mrf.mxu0  ;;  %v1629_v18 = vpop.f32.mrf.mxu1 }
 0x1dd   : > { %v1589_v58 = vpop.f32.mrf.mxu0  ;;  %v1630_v63 = vpop.f32.mrf.mxu1 }
 0x217   : > { %v1666_v21 = vpop.f32.mrf.mxu0  ;;  %v1707_v22 = vpop.f32.mrf.mxu1 }
 0x218   : > { %v1708_v23 = vadd.f32 %v1707_v22, %v1666_v21 }
 0x219   : > { %v1668_v24 = vpop.f32.mrf.mxu0  ;;  %v1709_v25 = vpop.f32.mrf.mxu1 }
 0x21a   : > { %v1710_v26 = vadd.f32 %v1709_v25, %v1668_v24 }
 0x21b   : > { %v1670_v27 = vpop.f32.mrf.mxu0  ;;  %v1711_v1 = vpop.f32.mrf.mxu1 }
 0x21d   : > { %v1671_v28 = vpop.f32.mrf.mxu0  ;;  %v1712_v4 = vpop.f32.mrf.mxu1 }
 0x257   : > { %v2417_v29 = vpop.f32.mrf.mxu0  ;;  %v2458_v30 = vpop.f32.mrf.mxu1 }
 0x258   : > { %v2418_v31 = vadd.f32 %v2417_v29, %v1626_v10 }
 0x259   : > { %v2419_v32 = vpop.f32.mrf.mxu0  ;;  %v2460_v33 = vpop.f32.mrf.mxu1 }
 0x25a   : > { %v2459_v34 = vadd.f32 %v2458_v30, %v2418_v31  ;;  %v2420_v35 = vadd.f32 %v2419_v32, %v1628_v13 }
 0x25b   : > { %v2421_v36 = vpop.f32.mrf.mxu0  ;;  %v2462_v37 = vpop.f32.mrf.mxu1 }
 0x25c   : > { %v2461_v38 = vadd.f32 %v2460_v33, %v2420_v35 }
 0x25d   : > { %v2422_v40 = vpop.f32.mrf.mxu0  ;;  %v2463_v41 = vpop.f32.mrf.mxu1 }
 0x25e   : > { %v2551_v42 = vcombine.low %v2459_v34, %v2461_v38 }
 0x260   : > { %v2559_v2 = vrot.slane %v2551_v42, %v4661_v57 }
 0x297   : > { %v2499_v45 = vpop.f32.mrf.mxu0  ;;  %v2540_v48 = vpop.f32.mrf.mxu1 }
 0x298   : > { %v2500_v50 = vadd.f32 %v2499_v45, %v1708_v23 }
 0x299   : > { %v2501_v51 = vpop.f32.mrf.mxu0  ;;  %v2542_v52 = vpop.f32.mrf.mxu1 }
 0x29a   : > { %v2502_v54 = vadd.f32 %v2501_v51, %v1710_v26  ;;  %v2541_v59 = vadd.f32 %v2540_v48, %v2500_v50 }
 0x29b   : > { %v2503_v55 = vpop.f32.mrf.mxu0  ;;  %v2544_v56 = vpop.f32.mrf.mxu1 }
 0x29c   : > { %v2543_v60 = vadd.f32 %v2542_v52, %v2502_v54 }
 0x29d   : > { %v2504_v61 = vpop.f32.mrf.mxu0  ;;  %v2545_v62 = vpop.f32.mrf.mxu1 }
 0x29e   : > { %v2552_v0 = vcombine.low %v2541_v59, %v2543_v60 }
 0x2a0   : > { %v2566_v3 = vrot.slane %v2552_v0, %v4661_v57 }
 0x2a2   : > { %v2567_v46 = vcombine.low %v2559_v2, %v2566_v3  ;;  %2574 = sbr.rel (%p3431_p2) target bundleno = 1054 (0x41e), region = 72 }
 0x2a4   : > { %v2569_v47 = vadd.f32 %v2567_v46, %v648_v39 }
 0x2a6   : > { %2570 = vst [vmem:[#allocation2] sm:$0xff] %v2569_v47 }
 0x2a7   : > { %v3977_v53 = vld [vmem:[%s4836_s7 + $0x78] sm:$0xff]   ;;  %v3981_v8 = vld [vmem:[%s4836_s7 + $0x70] sm:$0xff]   ;;  %v3985_v12 = vld [vmem:[%s4836_s7 + $0x68] sm:$0xff]   ;;  %vm2985_vm2 = vcmask 123904  }
 0x2a8   : > { %v3978_v5 = vld [vmem:[%s4836_s7 + $0xf8] sm:$0xff]   ;;  %3477 = vmatprep.subr.bf16.mxu0 %v3977_v53  ;;  %v3982_v9 = vld [vmem:[%s4836_s7 + $0xf0] sm:$0xff]   ;;  %v3986_v13 = vld [vmem:[%s4836_s7 + $0xe8] sm:$0xff]  }
 0x2a9   : > { %v3979_v6 = vld [vmem:[%s4836_s7 + $0x38] sm:$0xff]   ;;  %3499 = vmatprep.subr.bf16.mxu1 %v3978_v5  ;;  %v3983_v10 = vld [vmem:[%s4836_s7 + $0x30] sm:$0xff]   ;;  %v3987_v14 = vld [vmem:[%s4836_s7 + $0x28] sm:$0xff]  }
 0x2aa   : > { %v3980_v7 = vld [vmem:[%s4836_s7 + $0xb8] sm:$0xff]   ;;  %3478 = vmatpush3.bf16.msra.mxu0 %v3979_v6  ;;  %v3984_v11 = vld [vmem:[%s4836_s7 + $0xb0] sm:$0xff]   ;;  %v3988_v18 = vld [vmem:[%s4836_s7 + $0xa8] sm:$0xff]  }
 0x2ab   : > { %3500 = vmatpush3.bf16.msra.mxu1 %v3980_v7  ;;  %3479 = vmatprep.subr.bf16.mxu0 %v3981_v8  ;;  %v3989_v58 = vld [vmem:[%s4836_s7 + $0x60] sm:$0xff]   ;;  %v3993_v23 = vld [vmem:[%s4836_s7 + $0x58] sm:$0xff]   ;;  %v3997_v27 = vld [vmem:[%s4836_s7 + $0x50] sm:$0xff]  }
 0x2ac   : > { %3501 = vmatprep.subr.bf16.mxu1 %v3982_v9  ;;  %v3990_v63 = vld [vmem:[%s4836_s7 + $0xe0] sm:$0xff]   ;;  %v3994_v24 = vld [vmem:[%s4836_s7 + $0xd8] sm:$0xff]   ;;  %v3998_v1 = vld [vmem:[%s4836_s7 + $0xd0] sm:$0xff]  }
 0x2ad   : > { %v3991_v21 = vld [vmem:[%s4836_s7 + $0x20] sm:$0xff]   ;;  %v3995_v25 = vld [vmem:[%s4836_s7 + $0x18] sm:$0xff]   ;;  %v3999_v28 = vld [vmem:[%s4836_s7 + $0x10] sm:$0xff]  }
 0x2ae   : > { %3480 = vmatpush3.bf16.msra.mxu0 %v3983_v10  ;;  %v3992_v22 = vld [vmem:[%s4836_s7 + $0xa0] sm:$0xff]   ;;  %v3996_v26 = vld [vmem:[%s4836_s7 + $0x98] sm:$0xff]   ;;  %v4000_v4 = vld [vmem:[%s4836_s7 + $0x90] sm:$0xff]  }
 0x2af   : > { %3502 = vmatpush3.bf16.msra.mxu1 %v3984_v11  ;;  %3481 = vmatprep.subr.bf16.mxu0 %v3985_v12  ;;  %v4001_v29 = vld [vmem:[%s4836_s7 + $0x48] sm:$0xff]   ;;  %v4005_v33 = vld [vmem:[%s4836_s7 + $0x40] sm:$0xff]  }
 0x2b0   : > { %3503 = vmatprep.subr.bf16.mxu1 %v3986_v13  ;;  %v4002_v30 = vld [vmem:[%s4836_s7 + $0xc8] sm:$0xff]   ;;  %v4006_v34 = vld [vmem:[%s4836_s7 + $0xc0] sm:$0xff]  }
 0x2b1   : > { %v4003_v31 = vld [vmem:[%s4836_s7 + $0x8] sm:$0xff]   ;;  %v4007_v35 = vld [vmem:[%s4836_s7] sm:$0xff]  }
 0x2b2   : > { %3482 = vmatpush3.bf16.msra.mxu0 %v3987_v14  ;;  %v4004_v32 = vld [vmem:[%s4836_s7 + $0x88] sm:$0xff]   ;;  %v4008_v36 = vld [vmem:[%s4836_s7 + $0x80] sm:$0xff]  }
 0x2b3   : > { %3504 = vmatpush3.bf16.msra.mxu1 %v3988_v18  ;;  %3483 = vmatprep.subr.bf16.mxu0 %v3989_v58  ;;  %v2576_v37 = vld [vmem:[%s4835_s6] sm:$0xf] }
 0x2b4   : > { %3505 = vmatprep.subr.bf16.mxu1 %v3990_v63  ;;  %v2995_v38 = vld [vmem:[%s4838_s9] sm:$0x3]  ;;  %v2581_v40 = vrot.slane %v2576_v37, %v517_v16  ;;  %v2585_v41 = vrot.slane %v2576_v37, %v521_v19  ;;  %v2589_v42 = vrot.slane %v2576_v37, %v525_v17  ;;  %v2593_v43 = vrot.slane %v2576_v37, %v529_v20 }
 0x2b5   : > { %2997 = vrot.lane.b32.xlu0 %v2995_v38, %s4162_s22  ;;  %v2575_v50 = vld [vmem:[#allocation2] sm:$0xff] }
 0x2b6   : > { %3484 = vmatpush3.bf16.msra.mxu0 %v3991_v21  ;;  %v2594_v44 = vcombine.low %v2581_v40, %v2585_v41  ;;  %v2595_v45 = vcombine.low %v2589_v42, %v2593_v43  ;;  %v3432_v0 = vld [vmem:[%s4837_s8] ss:$0 sm:$0xff] }
 0x2b7   : > { %3506 = vmatpush3.bf16.msra.mxu1 %v3992_v22  ;;  %3485 = vmatprep.subr.bf16.mxu0 %v3993_v23 }
 0x2b8   : > { %3507 = vmatprep.subr.bf16.mxu1 %v3994_v24  ;;  %v2602_v48 = vrot.slane %v2594_v44, %v4661_v57  ;;  %v2609_v49 = vrot.slane %v2595_v45, %v4661_v57 }
 0x2ba   : > { %3486 = vmatpush3.bf16.msra.mxu0 %v3995_v25  ;;  %v2610_v51 = vcombine.low %v2602_v48, %v2609_v49 }
 0x2bb   : > { %3508 = vmatpush3.bf16.msra.mxu1 %v3996_v26  ;;  %3487 = vmatprep.subr.bf16.mxu0 %v3997_v27 }
 0x2bc   : > { %3509 = vmatprep.subr.bf16.mxu1 %v3998_v1  ;;  %v2612_v16 = vadd.f32 %v2610_v51, %v2575_v50 }
 0x2be   : > { %3488 = vmatpush3.bf16.msra.mxu0 %v3999_v28  ;;  %v2613_v52 = vmax.f32 %v2612_v16, 0.0 }
 0x2bf   : > { %3510 = vmatpush3.bf16.msra.mxu1 %v4000_v4  ;;  %3489 = vmatprep.subr.bf16.mxu0 %v4001_v29 }
 0x2c0   : > { %3511 = vmatprep.subr.bf16.mxu1 %v4002_v30  ;;  %v2622_v19 = vrot.slane %v2613_v52, %v4661_v57  ;;  %v2615_v54 = vcombine.high %v2613_v52, %v2613_v52 }
 0x2c2   : > { %3490 = vmatpush3.bf16.msra.mxu0 %v4003_v31  ;;  %v2630_v55 = vcombine.high %v2622_v19, %v2622_v19  ;;  %v2629_v17 = vrot.slane %v2615_v54, %v4661_v57  ;;  %v2636_v15 = vpack.c.bf16 %v2622_v19, %v2622_v19 }
 0x2c3   : > { %3512 = vmatpush3.bf16.msra.mxu1 %v4004_v32  ;;  %3491 = vmatprep.subr.bf16.mxu0 %v4005_v33 }
 0x2c4   : > { %3513 = vmatprep.subr.bf16.mxu1 %v4006_v34  ;;  %v2637_v20 = vpack.c.bf16 %v2630_v55, %v2630_v55  ;;  %v2631_v56 = vcombine.high %v2629_v17, %v2629_v17  ;;  %v2638_v59 = vpack.c.bf16 %v2629_v17, %v2629_v17 }
 0x2c6   : > { %3492 = vmatpush3.bf16.msra.mxu0 %v4007_v35  ;;  %2935 = vmatprep.mubr.bf16.mxu0 %v2637_v20  ;;  %v2639_v60 = vpack.c.bf16 %v2631_v56, %v2631_v56 }
 0x2c7   : > { %3514 = vmatpush3.bf16.msra.mxu1 %v4008_v36 }
 0x2c8   : > { %2975 = vmatprep.mubr.bf16.mxu1 %v2639_v60 }
 0x2c9   : > { %2936 = vmatmul.mubr.bf16.vlgmr.msra.gmra.mxu0 %v2636_v15 }
 0x2ca   : > { %2976 = vmatmul.mubr.bf16.vlgmr.msra.gmra.mxu1 %v2638_v59 }
 0x327   : > { %v2998_v11 = vpop.permute.xlu0 %2997 }
 0x389   : > { %v3493_v61 = vpop.f32.mrf.mxu0 }
 0x38a   : > { %v3515_v62 = vpop.f32.mrf.mxu1 }
 0x38b   : > { %v3494_v2 = vpop.f32.mrf.mxu0 }
 0x38c   : > { %v3495_v3 = vadd.f32 %v3494_v2, %v3493_v61  ;;  %v3516_v39 = vpop.f32.mrf.mxu1 }
 0x38d   : > { %v3496_v46 = vpop.f32.mrf.mxu0  ;;  %v3517_v47 = vadd.f32 %v3516_v39, %v3515_v62 }
 0x38e   : > { %v2938_v57 = vadd.f32 %v3495_v3, %v3432_v0  ;;  %v3518_v53 = vpop.f32.mrf.mxu1 }
 0x38f   : > { %v3497_v5 = vpop.f32.mrf.mxu0 }
 0x390   : > { %v2978_v6 = vadd.f32 %v3517_v47, %v2938_v57  ;;  %v3519_v7 = vpop.f32.mrf.mxu1 }
 0x392   : > { %v3465_v8 = vclamps-f32 %v2978_v6, 10.0  ;;  %2986 = vst.msk [vmem:[#allocation6] sm:$0x3] %vm2985_vm2, %v2978_v6 }
 0x394   : > { %2988 = vrot.lane.b32.xlu1 %v3465_v8, %s4163_s27  ;;  %v2992_v9 = vmul.f32 0.5, %v3465_v8 }
 0x396   : > { %v2993_v10 = vmul.f32 1.442695, %v2992_v9 }
 0x398   : > { %4009 = vpow2.f32 %v2993_v10 }
 0x3a5   : > { %v4010_v12 = vpop.eup %4009 }
 0x3a6   : > { %v3000_v13 = vmul.f32 %v4010_v12, %v2998_v11 }
 0x3a8   : > { %3002 = vrot.lane.b32.xlu0 %v3000_v13, %s4163_s27 }
 0x406   : > { %v2989_v14 = vpop.permute.xlu1 %2988 }
 0x407   : > { %2991 = vst.msk [vmem:[#allocation7] sm:$0x3] %vm2985_vm2, %v2989_v14 }
 0x41a   : > { %v3003_v18 = vpop.permute.xlu0 %3002 }
 0x41b   : > { %v3005_v58 = vadd.f32 %v3003_v18, %v2978_v6 }
 0x41d   : > { %3006 = vst.msk [vmem:[#allocation9] sm:$0x3] %vm2985_vm2, %v3005_v58 }
 0x41e PF: > { %p3540_p3 = scmp.eq.s32.totalorder %s4251_s25, 1  ;;  %s4164_s30 = smov [#allocation7]  }
 0x41f   : > { %s3025_s15 = sshll.u32 %s4164_s30, 4  ;;  %s4165_s28 = smov [#allocation6]   ;;  %s3026_s15 = int_to_ptr.vmem [resolvable:$true] %s3025_s15 }
 0x420   : > { %s3014_s16 = sshll.u32 %s4165_s28, 4  ;;  %s4039_s23 = scalar_lea.vmem %s3026_s15, 32  ;;  %s3015_s16 = int_to_ptr.vmem [resolvable:$true] %s3014_s16 }
 0x421   : > { %p4040_p4 = scmp.ne.s32.totalorder %s3026_s15, %s4039_s23  ;;  %p4046_p10 = scmp.lt.s32.totalorder %s3026_s15, %s3026_s15 }
 0x422   : > { %p4047_p12 = scmp.lt.s32.totalorder %s4039_s23, %s4039_s23 }
 0x423   : > { %p4041_p5 = pnand %p4040_p4, %p3540_p3 }
 0x424   : > { %p4048_p11 = por %p4047_p12, %p4046_p10 }
 0x425   : > { %p4042_p6 = pneg %p4041_p5 }
 0x427   : > { %p4049_p13 = pnand %p4048_p11, %p4042_p6 }
 0x429   : > { %4052 = shalt.err (!%p4049_p13)
}
 0x42a   : > { %3526 = dma.vmem_to_hbm [thread:$0]  (%p3540_p3), %s3026_s15, 32, %s4840_s11, [#allocation8]  }
 0x42b   : > { %s4063_s24 = scalar_lea.vmem %s3015_s16, 32  ;;  %p4070_p9 = scmp.lt.s32.totalorder %s3015_s16, %s3015_s16 }
 0x42c   : > { %p4064_p0 = scmp.ne.s32.totalorder %s3015_s16, %s4063_s24  ;;  %p4071_p1 = scmp.lt.s32.totalorder %s4063_s24, %s4063_s24 }
 0x42e   : > { %p4065_p7 = pnand %p4064_p0, %p3540_p3  ;;  %p4072_p2 = por %p4071_p1, %p4070_p9 }
 0x430   : > { %p4066_p8 = pneg %p4065_p7 }
 0x432   : > { %p4073_p4 = pnand %p4072_p2, %p4066_p8 }
 0x434   : > { %4076 = shalt.err (!%p4073_p4)
}
 0x435   : > { %3524 = dma.vmem_to_hbm [thread:$0]  (%p3540_p3), %s3015_s16, 32, %s4839_s10, [#allocation5]  }
 0x436   : > { %s4166_s18 = smov [#allocation9]  }
 0x437   : > { %s3036_s19 = sshll.u32 %s4166_s18, 4  ;;  %s3037_s19 = int_to_ptr.vmem [resolvable:$true] %s3036_s19 }
 0x438   : > { %s4087_s13 = scalar_lea.vmem %s3037_s19, 32  ;;  %p4094_p12 = scmp.lt.s32.totalorder %s3037_s19, %s3037_s19 }
 0x439   : > { %p4088_p5 = scmp.ne.s32.totalorder %s3037_s19, %s4087_s13  ;;  %p4095_p11 = scmp.lt.s32.totalorder %s4087_s13, %s4087_s13 }
 0x43b   : > { %p4089_p6 = pnand %p4088_p5, %p3540_p3  ;;  %p4096_p13 = por %p4095_p11, %p4094_p12 }
 0x43d   : > { %p4090_p10 = pneg %p4089_p6 }
 0x43f   : > { %p4097_p0 = pnand %p4096_p13, %p4090_p10 }
 0x441   : > { %4100 = shalt.err (!%p4097_p0)
}
 0x442   : > { %3528 = dma.vmem_to_hbm [thread:$0]  (%p3540_p3), %s3037_s19, 32, %s4841_s12, [#allocation8]  }
 0x443   : > { %4132 = dma.done.wait (%p3540_p3), [#allocation5], 32  }
 0x444   : > { %4134 = vsyncadd (%p3540_p3), [#allocation5], 4294967264 }
 0x445   : > { %4136 = dma.done.wait (%p3540_p3), [#allocation8], 64  }
 0x446   : > { %4138 = vsyncadd (%p3540_p3), [#allocation8], 4294967232 }
 0x447 PF: > { %s4854_s21 = sld [smem:[#allocation13_spill]]  ;;  %p25_p7 = scmp.ge.s32.totalorder %s4254_s26, 4  }
 0x448   : > { %s4855_s22 = sld [smem:[#allocation14_spill]]  ;;  %s4857_s24 = smov %s4254_s26 }
 0x449   : > { %s4856_s23 = sld [smem:[#allocation15_spill]]  ;;  %27 = sbr.rel (!%p25_p7) target bundleno = 7 (0x7), region = 133 }
 0x44e   :  { %3057 = vsyncpa [#allocation4], 1 }
 0x44f   :  { %3059 = vsyncpa [#allocation4 + $0x1], 1 }
 0x450   :  { %3060 = vsyncpa [#allocation5], 1 }
 0x451   :  { %3062 = vsyncpa [#allocation5 + $0x1], 1 }
 0x452   :  { %3063 = vsyncpa [#allocation8], 1 }

</bundles_post_ra>
